<compile_context>
chip_gen: v7x
topology: tpu7x:2x2x1
jax: 0.10.0
libtpu: 0.0.40
codegen_flags: <defaults>
</compile_context>

<pallas_src>
import math

import jax
import jax.numpy as jnp
import numpy as np
from jax import lax
from jax.experimental import pallas as pl
from jax.experimental.pallas import tpu as pltpu

LANE = 128
SUBLANE = 8


def _round_up(x, m):
    return ((x + m - 1) // m) * m


def _nbytes(shape, dtype):
    return int(np.prod(shape)) * np.dtype(dtype).itemsize


# ------------------------------------------------------------------ kernel ---

def _make_layer_kernel(*, fold_zd, tc, bp, hp, hhp, unroll):
    """Builds one MetaRNN-layer kernel; static config (fold path, sizes) closed over."""
    nx = hhp + hp  # width of the precomputed x-dependent slab: [hyper part | main part]

    def kernel(*refs):
        if fold_zd:
            (x_ref, w_x_ref, b_x_ref, w_rec_ref, w_hyp_hh_ref, w_eff_ref,
             b_eff_ref, b_ref, o_ref, xh_scr, h_scr, hh_scr) = refs
        else:
            (x_ref, w_x_ref, b_x_ref, w_rec_ref, w_hyp_hh_ref, w_z_ref, w_d_ref,
             b_eff_ref, b_ref, o_ref, xh_scr, h_scr, hh_scr) = refs

        # initialize the carried state at the first time chunk
        @pl.when(pl.program_id(0) == 0)
        def _():
            h_scr[...] = jnp.zeros_like(h_scr)
            hh_scr[...] = jnp.zeros_like(hh_scr)

        cd = w_x_ref.dtype  # matmul operand dtype (f32 or bf16); accumulation is f32

        # ---- once per chunk: x-dependent matmuls hoisted out of the recurrence ----
        # single high-M matmul: (Tc*Bp, Ip) @ (Ip, Hhp+Hp); hyper bias pre-folded in.
        x_flat = x_ref[...].reshape(tc * bp, x_ref.shape[2]).astype(cd)
        x_pre = jnp.dot(x_flat, w_x_ref[...], preferred_element_type=jnp.float32)
        x_pre = x_pre + b_x_ref[...]
        xh_scr[...] = x_pre.reshape(tc, bp, nx)

        # hoist loop-invariant weight loads + bias broadcasts out of the time loop
        # (JAX does not CSE broadcast_in_dim inside the unrolled loop).
        w_rec = w_rec_ref[...]
        w_hyp_hh = w_hyp_hh_ref[...]
        if fold_zd:
            w_eff = w_eff_ref[...]
        else:
            w_z = w_z_ref[...]
            w_d = w_d_ref[...]
        b_eff = jnp.broadcast_to(b_eff_ref[...], (bp, 2 * hp))
        b_main = jnp.broadcast_to(b_ref[...], (bp, hp))

        def step(t, carry):
            h, hh = carry                       # f32 state carried in vregs
            xh = xh_scr[t]                      # (Bp, Hhp+Hp): precomputed x terms
            x_hyp = xh[:, :hhp]                 # x@W_hyp_x + b_hyp
            x_main = xh[:, hhp:]                # x@W_ih

            # fused recurrent matmul: h @ [W_hyp_h | W_hh]   (one MXU issue)
            rec = jnp.dot(h.astype(cd), w_rec, preferred_element_type=jnp.float32)
            hyp = jnp.dot(hh.astype(cd), w_hyp_hh, preferred_element_type=jnp.float32)
            hh_new = jnp.tanh(x_hyp + rec[:, :hhp] + hyp)

            # z->d chain: folded single matmul or two-stage (N-fused) path
            hh_c = hh_new.astype(cd)
            if fold_zd:
                eff = jnp.dot(hh_c, w_eff, preferred_element_type=jnp.float32)
            else:
                z = jnp.dot(hh_c, w_z, preferred_element_type=jnp.float32)
                eff = jnp.dot(z.astype(cd), w_d, preferred_element_type=jnp.float32)
            eff = eff + b_eff
            d_h = eff[:, :hp]
            d_x = eff[:, hp:]

            h_new = jnp.tanh(d_h * rec[:, hhp:] + d_x * x_main + b_main)
            o_ref[t] = h_new.astype(o_ref.dtype)
            return (h_new, hh_new)

        h_fin, hh_fin = lax.fori_loop(0, tc, step, (h_scr[...], hh_scr[...]),
                                      unroll=unroll)
        # write carried state back to scratch once per chunk (not per step)
        h_scr[...] = h_fin
        hh_scr[...] = hh_fin

    return kernel


# --------------------------------------------------------- parameter setup ---

def init_layer_params(key, input_size, hidden_size, hyper_hidden_size,
                      hyper_embedding_size):
    """Raw parameters, PyTorch (out_features, in_features) layout."""
    H, Hh, Hz, I = hidden_size, hyper_hidden_size, hyper_embedding_size, input_size
    ks = jax.random.split(key, 13)

    def u(k, shape, fan):
        s = 1.0 / math.sqrt(fan)
        return jax.random.uniform(k, shape, jnp.float32, -s, s)

    return {
        "w_ih":     u(ks[0],  (H, I),       H),
        "w_hh":     u(ks[1],  (H, H),       H),
        "b":        u(ks[2],  (1, H),       H),
        "w_hyp_ih": u(ks[3],  (Hh, I + H),  Hh),
        "w_hyp_hh": u(ks[4],  (Hh, Hh),     Hh),
        "b_hyp_ih": u(ks[5],  (1, Hh),      Hh),
        "b_hyp_hh": u(ks[6],  (1, Hh),      Hh),
        "w_zh":     u(ks[7],  (Hz, Hh),     Hh),
        "b_zh":     u(ks[8],  (1, Hz),      Hh),
        "w_zx":     u(ks[9],  (Hz, Hh),     Hh),
        "b_zx":     u(ks[10], (1, Hz),      Hh),
        "w_dh":     u(ks[11], (H, Hz),      Hz),
        "w_dx":     u(ks[12], (H, Hz),      Hz),
    }


def _pad2d(a, rows, cols, dtype):
    a = jnp.asarray(a, jnp.float32)
    out = jnp.zeros((rows, cols), jnp.float32).at[:a.shape[0], :a.shape[1]].set(a)
    return out.astype(dtype)


def prepare_layer_params(p, input_size, hidden_size, hyper_hidden_size,
                         weight_dtype=jnp.float32, force_fold=None):
    """Fold / fuse / pre-transpose / zero-pad raw params for the kernel (host-side)."""
    I, H, Hh = input_size, hidden_size, hyper_hidden_size
    Hz = p["w_dh"].shape[1]
    Ip, Hp, Hhp, Hzp = (_round_up(v, LANE) for v in (I, H, Hh, Hz))

    w_hyp_x = p["w_hyp_ih"][:, :I]          # (Hh, I)   concat removed: split x / h parts
    w_hyp_h = p["w_hyp_ih"][:, I:]          # (Hh, H)
    b_hyp = p["b_hyp_ih"] + p["b_hyp_hh"]   # pre-summed hyper bias

    # x-precompute weight: x @ [W_hyp_x.T | W_ih.T]  (one high-M matmul per chunk)
    w_x = jnp.concatenate(
        [_pad2d(jnp.asarray(w_hyp_x, jnp.float32).T, Ip, Hhp, weight_dtype),
         _pad2d(jnp.asarray(p["w_ih"], jnp.float32).T, Ip, Hp, weight_dtype)], axis=1)
    # hyper bias folded into the hyper columns of the x-precompute (main cols stay 0)
    b_x = jnp.concatenate([_pad2d(b_hyp, 1, Hhp, jnp.float32),
                           jnp.zeros((1, Hp), jnp.float32)], axis=1)

    # fused recurrent weight: h @ [W_hyp_h.T | W_hh.T]
    w_rec = jnp.concatenate(
        [_pad2d(jnp.asarray(w_hyp_h, jnp.float32).T, Hp, Hhp, weight_dtype),
         _pad2d(jnp.asarray(p["w_hh"], jnp.float32).T, Hp, Hp, weight_dtype)], axis=1)
    w_hyp_hh = _pad2d(jnp.asarray(p["w_hyp_hh"], jnp.float32).T, Hhp, Hhp, weight_dtype)

    # z->d chain: fold to one matmul only when the padded fold does not inflate
    # MXU work (at production sizes Hz << Hh, H keeps the two-stage path).
    fold = (Hhp * Hp <= Hzp * (Hhp + Hp)) if force_fold is None else bool(force_fold)
    b_eff = jnp.concatenate([_pad2d(p["b_zh"] @ p["w_dh"].T, 1, Hp, jnp.float32),
                             _pad2d(p["b_zx"] @ p["w_dx"].T, 1, Hp, jnp.float32)], axis=1)
    if fold:
        w_eff = jnp.concatenate(
            [_pad2d((p["w_dh"] @ p["w_zh"]).T, Hhp, Hp, weight_dtype),
             _pad2d((p["w_dx"] @ p["w_zx"]).T, Hhp, Hp, weight_dtype)], axis=1)
        eff_weights = (w_eff,)
    else:
        w_z = jnp.concatenate(
            [_pad2d(jnp.asarray(p["w_zh"], jnp.float32).T, Hhp, Hzp, weight_dtype),
             _pad2d(jnp.asarray(p["w_zx"], jnp.float32).T, Hhp, Hzp, weight_dtype)], axis=1)
        w_d = jnp.zeros((2 * Hzp, 2 * Hp), jnp.float32)
        w_d = w_d.at[:Hz, :H].set(jnp.asarray(p["w_dh"], jnp.float32).T)
        w_d = w_d.at[Hzp:Hzp + Hz, Hp:Hp + H].set(jnp.asarray(p["w_dx"], jnp.float32).T)
        eff_weights = (w_z, w_d.astype(weight_dtype))

    b_main = _pad2d(p["b"], 1, Hp, jnp.float32)

    weights = (w_x, b_x, w_rec, w_hyp_hh) + eff_weights + (b_eff, b_main)
    return weights, fold, (Ip, Hp, Hhp)


# ------------------------------------------------------------ layer driver ---

def meta_rnn_layer(x_seq, weights, fold_zd, time_chunk, Bp, Ip, Hp, Hhp,
                   out_dtype=jnp.float32):
    """One MetaRNN layer over a padded, time-major sequence.

    x_seq: (Tp, Bp, Ip), Tp % time_chunk == 0.  returns (Tp, Bp, Hp) in out_dtype.
    """
    Tp = x_seq.shape[0]
    assert x_seq.shape == (Tp, Bp, Ip) and Tp % time_chunk == 0
    nx = Hhp + Hp
    Tc = time_chunk
    unroll = int(max(1, min(8, Tc)))          # partial unroll keeps LLO visibility

    kernel = _make_layer_kernel(fold_zd=fold_zd, tc=Tc, bp=Bp, hp=Hp, hhp=Hhp,
                                unroll=unroll)

    # VMEM budget: double-buffered x / out blocks + weights + scratch; keep the
    # requested scoped-VMEM limit under v7x's 64 MiB physical VMEM.
    est = (2 * _nbytes((Tc, Bp, Ip), x_seq.dtype)
           + 2 * _nbytes((Tc, Bp, Hp), out_dtype)
           + 2 * sum(_nbytes(w.shape, w.dtype) for w in weights)
           + _nbytes((Tc, Bp, nx), jnp.float32)
           + _nbytes((Bp, Hp), jnp.float32) + _nbytes((Bp, Hhp), jnp.float32))
    vmem_limit = int(min(max(2 * est, 8 << 20), 64 << 20))

    # TODO(synk): at production H, single-buffer the constant weight operands
    # (pipeline_mode=pl.Buffered(1)) to halve their VMEM footprint (matters on v7x).
    grid_spec = pltpu.PrefetchScalarGridSpec(
        num_scalar_prefetch=0,
        grid=(Tp // Tc,),
        in_specs=[pl.BlockSpec((Tc, Bp, Ip), lambda c: (c, 0, 0))]
                 + [pl.BlockSpec(w.shape, lambda c: (0, 0)) for w in weights],
        out_specs=pl.BlockSpec((Tc, Bp, Hp), lambda c: (c, 0, 0)),
        scratch_shapes=[
            pltpu.VMEM((Tc, Bp, nx), jnp.float32),   # precomputed x-dependent terms
            pltpu.VMEM((Bp, Hp), jnp.float32),       # carried main hidden state
            pltpu.VMEM((Bp, Hhp), jnp.float32),      # carried hyper hidden state
        ],
    )

    # TODO(synk): on v7x (2 TensorCores) add a leading 'parallel' grid axis over
    # sublane-aligned batch sub-blocks (time stays 'arbitrary').
    return pl.pallas_call(
        kernel,
        out_shape=jax.ShapeDtypeStruct((Tp, Bp, Hp), out_dtype),
        grid_spec=grid_spec,
        compiler_params=pltpu.CompilerParams(
            dimension_semantics=("arbitrary",),      # time recurrence is serial
            vmem_limit_bytes=vmem_limit),
    )(x_seq, *weights)


# ------------------------------------------------------- full module forward ---

def meta_rnn_base_forward(x_btf, layer_params, input_size, hidden_size,
                          hyper_hidden_size, weight_dtype=jnp.float32,
                          time_chunk=32, force_fold=None):
    """MetaRNNBase.forward for mode='MetaRNN', unidirectional.

    x_btf: (B, T, I) batch-first.  returns (output_seq (B,T,H), last_hidden (B,H)).
    """
    B, T, I = x_btf.shape
    H = hidden_size
    use_bf16 = weight_dtype == jnp.bfloat16
    # 16-row batch padding gives clean bf16 sublane packing for bf16 activations.
    Bp = _round_up(B, 16 if use_bf16 else SUBLANE)
    Tc = max(1, min(time_chunk, T))
    Tp = _round_up(T, Tc)   # padded tail timesteps are computed then sliced off
    inter_dtype = jnp.bfloat16 if use_bf16 else jnp.float32

    prepared = []
    in_sz = input_size
    for p in layer_params:
        weights, fold, dims = prepare_layer_params(
            p, in_sz, hidden_size, hyper_hidden_size, weight_dtype, force_fold)
        prepared.append((weights, fold, dims))
        in_sz = hidden_size

    # pad input to (Tp, Bp, Ip0) time-major; zero padding keeps padded lanes/rows inert
    Ip0 = prepared[0][2][0]
    x_tbf = jnp.transpose(x_btf, (1, 0, 2)).astype(jnp.float32)
    x_pad = jnp.zeros((Tp, Bp, Ip0), jnp.float32).at[:T, :B, :I].set(x_tbf)

    # TODO(synk): fuse the layer stack into one pallas_call (padded weight shapes are
    # uniform) to drop the inter-layer HBM round-trip and per-layer dispatch.
    h_seq = x_pad
    n_layers = len(prepared)
    for li, (weights, fold, (Ip, Hp, Hhp)) in enumerate(prepared):
        out_dt = jnp.float32 if li == n_layers - 1 else inter_dtype
        h_seq = meta_rnn_layer(h_seq, weights, fold, Tc, Bp, Ip, Hp, Hhp, out_dt)

    out_bth = jnp.transpose(h_seq[:T, :B, :H], (1, 0, 2))
    return out_bth, out_bth[:, -1, :]


# ------------------------------------------------------------ pure-JAX ref ---

def _reference_forward(x_btf, layer_params, hidden_size, hyper_hidden_size):
    B, T, _ = x_btf.shape
    x_seq = x_btf
    for p in layer_params:
        h = jnp.zeros((B, hidden_size), jnp.float32)
        hh = jnp.zeros((B, hyper_hidden_size), jnp.float32)
        outs = []
        for t in range(T):
            x = x_seq[:, t, :]
            x_hat = jnp.concatenate([x, h], axis=1)
            hh = jnp.tanh(x_hat @ p["w_hyp_ih"].T + hh @ p["w_hyp_hh"].T
                          + p["b_hyp_ih"] + p["b_hyp_hh"])
            z_h = hh @ p["w_zh"].T + p["b_zh"]
            z_x = hh @ p["w_zx"].T + p["b_zx"]
            d_h = z_h @ p["w_dh"].T
            d_x = z_x @ p["w_dx"].T
            h = jnp.tanh(d_h * (h @ p["w_hh"].T) + d_x * (x @ p["w_ih"].T) + p["b"])
            outs.append(h)
        x_seq = jnp.stack(outs, axis=1)
    return x_seq, x_seq[:, -1, :]


# --------------------------------------------------------------------- main ---

if __name__ == "__main__":
    # batch=4, seq=8, input=16, hidden=32, hyper_hidden=16, hyper_embedding=8,
    # num_layers=2, mode='MetaRNN', unidirectional.
    B, T, I = 4, 8, 16
    H, Hh, Hz = 32, 16, 8
    NUM_LAYERS = 2

    key = jax.random.PRNGKey(0)
    kx, k0, k1 = jax.random.split(key, 3)
    x = jax.random.normal(kx, (B, T, I), jnp.float32)

    layer_params = [
        init_layer_params(k0, I, H, Hh, Hz),     # layer 0: input_size = I
        init_layer_params(k1, H, H, Hh, Hz),     # layer 1: input_size = hidden_size
    ][:NUM_LAYERS]

    ref_seq, ref_last = _reference_forward(x, layer_params, H, Hh)

    # f32 path, time_chunk=4 -> 2 grid chunks (exercises cross-chunk carried state)
    out_seq, last_h = meta_rnn_base_forward(
        x, layer_params, I, H, Hh, weight_dtype=jnp.float32, time_chunk=4)
    jax.block_until_ready(out_seq)
    jax.block_until_ready(last_h)
    np.testing.assert_allclose(np.asarray(out_seq), np.asarray(ref_seq),
                               rtol=1e-2, atol=1e-2)
    np.testing.assert_allclose(np.asarray(last_h), np.asarray(ref_last),
                               rtol=1e-2, atol=1e-2)
    assert out_seq.shape == (B, T, H) and last_h.shape == (B, H)

    # unfused z->d path + non-dividing time chunk (Tc=3 -> Tp=9, padded tail)
    out_nf, _ = meta_rnn_base_forward(
        x, layer_params, I, H, Hh, weight_dtype=jnp.float32, time_chunk=3,
        force_fold=False)
    jax.block_until_ready(out_nf)
    np.testing.assert_allclose(np.asarray(out_nf), np.asarray(ref_seq),
                               rtol=1e-2, atol=1e-2)

    # bf16 MXU operand path (also valid on v5e: MXU takes bf16 operands; state,
    # biases and tanh stay f32; inter-layer activations emitted in bf16).
    out_bf16, _ = meta_rnn_base_forward(
        x, layer_params, I, H, Hh, weight_dtype=jnp.bfloat16, time_chunk=8)
    jax.block_until_ready(out_bf16)
    assert bool(jnp.all(jnp.isfinite(out_bf16)))
    assert float(jnp.max(jnp.abs(out_bf16.astype(jnp.float32) - ref_seq))) < 1e-1

    # TODO(synk): MetaLSTM mode and the bidirectional branch are not implemented
    # (same kernel structure; would add cell-state scratch / a reversed-time pass).
    print("KERNEL_OK")
</pallas_src>

<mosaic_0001>
module attributes {stable_mosaic.version = 11 : i64} {
  func.func @kernel(%arg0: i32, %arg1: memref<4x8x128xf32, #tpu.memory_space<vmem>>, %arg2: memref<128x256xf32, #tpu.memory_space<vmem>>, %arg3: memref<1x256xf32, #tpu.memory_space<vmem>>, %arg4: memref<128x256xf32, #tpu.memory_space<vmem>>, %arg5: memref<128x128xf32, #tpu.memory_space<vmem>>, %arg6: memref<128x256xf32, #tpu.memory_space<vmem>>, %arg7: memref<1x256xf32, #tpu.memory_space<vmem>>, %arg8: memref<1x128xf32, #tpu.memory_space<vmem>>, %arg9: memref<4x8x128xf32, #tpu.memory_space<vmem>>, %arg10: memref<4x8x256xf32, #tpu.memory_space<vmem>>, %arg11: memref<8x128xf32, #tpu.memory_space<vmem>>, %arg12: memref<8x128xf32, #tpu.memory_space<vmem>>) attributes {dimension_semantics = [#tpu.dimension_semantics<arbitrary>], iteration_bounds = array<i64: 2>, scalar_prefetch = 0 : i64, scratch_operands = 3 : i64, tpu.core_type = #tpu.core_type<tc>, window_params = [{transform_indices = @transform_0, window_bounds = array<i64: 4, 8, 128>}, {pipeline_mode = #tpu.pipeline_mode<synchronous>, transform_indices = @transform_1, window_bounds = array<i64: 128, 256>}, {pipeline_mode = #tpu.pipeline_mode<synchronous>, transform_indices = @transform_2, window_bounds = array<i64: 1, 256>}, {pipeline_mode = #tpu.pipeline_mode<synchronous>, transform_indices = @transform_3, window_bounds = array<i64: 128, 256>}, {pipeline_mode = #tpu.pipeline_mode<synchronous>, transform_indices = @transform_4, window_bounds = array<i64: 128, 128>}, {pipeline_mode = #tpu.pipeline_mode<synchronous>, transform_indices = @transform_5, window_bounds = array<i64: 128, 256>}, {pipeline_mode = #tpu.pipeline_mode<synchronous>, transform_indices = @transform_6, window_bounds = array<i64: 1, 256>}, {pipeline_mode = #tpu.pipeline_mode<synchronous>, transform_indices = @transform_7, window_bounds = array<i64: 1, 128>}, {transform_indices = @transform_8, window_bounds = array<i64: 4, 8, 128>}]} {
    %c0_i32 = arith.constant 0 : i32
    %0 = arith.cmpi eq, %arg0, %c0_i32 : i32
    %1 = arith.extui %0 : i1 to i32
    %c0_i32_0 = arith.constant 0 : i32
    %2 = arith.cmpi ne, %1, %c0_i32_0 : i32
    scf.if %2 {
      %cst_57 = arith.constant 0.000000e+00 : f32
      %125 = vector.broadcast %cst_57 : f32 to vector<8x128xf32>
      %c0_58 = arith.constant 0 : index
      %c0_59 = arith.constant 0 : index
      %126 = vector.load %arg11[%c0_58, %c0_59] : memref<8x128xf32, #tpu.memory_space<vmem>>, vector<8x128xf32>
      tpu.vector_store %arg11[%c0_58, %c0_59], %125 {strides = array<i32>} : memref<8x128xf32, #tpu.memory_space<vmem>>, vector<8x128xf32>,
      %cst_60 = arith.constant 0.000000e+00 : f32
      %127 = vector.broadcast %cst_60 : f32 to vector<8x128xf32>
      %c0_61 = arith.constant 0 : index
      %c0_62 = arith.constant 0 : index
      %128 = vector.load %arg12[%c0_61, %c0_62] : memref<8x128xf32, #tpu.memory_space<vmem>>, vector<8x128xf32>
      tpu.vector_store %arg12[%c0_61, %c0_62], %127 {strides = array<i32>} : memref<8x128xf32, #tpu.memory_space<vmem>>, vector<8x128xf32>,
    } else {
    }
    %c0 = arith.constant 0 : index
    %c0_1 = arith.constant 0 : index
    %c0_2 = arith.constant 0 : index
    %3 = vector.load %arg1[%c0, %c0_1, %c0_2] : memref<4x8x128xf32, #tpu.memory_space<vmem>>, vector<4x8x128xf32>
    %4 = vector.shape_cast %3 : vector<4x8x128xf32> to vector<32x128xf32>
    %c0_3 = arith.constant 0 : index
    %c0_4 = arith.constant 0 : index
    %5 = vector.load %arg2[%c0_3, %c0_4] : memref<128x256xf32, #tpu.memory_space<vmem>>, vector<128x256xf32>
    %cst = arith.constant dense<0.000000e+00> : vector<32x256xf32>
    %6 = tpu.matmul %4, %5, %cst {dimension_numbers = #tpu.dot_dimension_numbers<[1], [0], [0], [1], [0, 0, 1, 1], [], []>} : vector<32x128xf32>, vector<128x256xf32>, vector<32x256xf32> -> vector<32x256xf32>
    %c0_5 = arith.constant 0 : index
    %c0_6 = arith.constant 0 : index
    %7 = vector.load %arg3[%c0_5, %c0_6] : memref<1x256xf32, #tpu.memory_space<vmem>>, vector<1x256xf32>
    %8 = vector.broadcast %7 : vector<1x256xf32> to vector<32x256xf32>
    %9 = arith.addf %6, %8 : vector<32x256xf32>
    %10 = vector.shape_cast %9 : vector<32x256xf32> to vector<4x8x256xf32>
    %c0_7 = arith.constant 0 : index
    %c0_8 = arith.constant 0 : index
    %c0_9 = arith.constant 0 : index
    %11 = vector.load %arg10[%c0_7, %c0_8, %c0_9] : memref<4x8x256xf32, #tpu.memory_space<vmem>>, vector<4x8x256xf32>
    tpu.vector_store %arg10[%c0_7, %c0_8, %c0_9], %10 {strides = array<i32>} : memref<4x8x256xf32, #tpu.memory_space<vmem>>, vector<4x8x256xf32>,
    %c0_10 = arith.constant 0 : index
    %c0_11 = arith.constant 0 : index
    %12 = vector.load %arg4[%c0_10, %c0_11] : memref<128x256xf32, #tpu.memory_space<vmem>>, vector<128x256xf32>
    %c0_12 = arith.constant 0 : index
    %c0_13 = arith.constant 0 : index
    %13 = vector.load %arg5[%c0_12, %c0_13] : memref<128x128xf32, #tpu.memory_space<vmem>>, vector<128x128xf32>
    %c0_14 = arith.constant 0 : index
    %c0_15 = arith.constant 0 : index
    %14 = vector.load %arg6[%c0_14, %c0_15] : memref<128x256xf32, #tpu.memory_space<vmem>>, vector<128x256xf32>
    %c0_16 = arith.constant 0 : index
    %c0_17 = arith.constant 0 : index
    %15 = vector.load %arg7[%c0_16, %c0_17] : memref<1x256xf32, #tpu.memory_space<vmem>>, vector<1x256xf32>
    %16 = vector.shape_cast %15 : vector<1x256xf32> to vector<1x256xf32>
    %17 = vector.broadcast %16 : vector<1x256xf32> to vector<8x256xf32>
    %c0_18 = arith.constant 0 : index
    %c0_19 = arith.constant 0 : index
    %18 = vector.load %arg8[%c0_18, %c0_19] : memref<1x128xf32, #tpu.memory_space<vmem>>, vector<1x128xf32>
    %19 = vector.shape_cast %18 : vector<1x128xf32> to vector<1x128xf32>
    %20 = vector.broadcast %19 : vector<1x128xf32> to vector<8x128xf32>
    %c0_20 = arith.constant 0 : index
    %c0_21 = arith.constant 0 : index
    %21 = vector.load %arg11[%c0_20, %c0_21] : memref<8x128xf32, #tpu.memory_space<vmem>>, vector<8x128xf32>
    %c0_22 = arith.constant 0 : index
    %c0_23 = arith.constant 0 : index
    %22 = vector.load %arg12[%c0_22, %c0_23] : memref<8x128xf32, #tpu.memory_space<vmem>>, vector<8x128xf32>
    %c0_i32_24 = arith.constant 0 : i32
    %23 = arith.index_cast %c0_i32_24 : i32 to index
    %c0_25 = arith.constant 0 : index
    %c0_26 = arith.constant 0 : index
    %24 = vector.load %arg10[%23, %c0_25, %c0_26] : memref<4x8x256xf32, #tpu.memory_space<vmem>>, vector<1x8x256xf32>
    %25 = vector.shape_cast %24 : vector<1x8x256xf32> to vector<8x256xf32>
    %26 = vector.extract_strided_slice %25 {offsets = [0, 0], sizes = [8, 128], strides = [1, 1]} : vector<8x256xf32> to vector<8x128xf32>
    %27 = vector.extract_strided_slice %25 {offsets = [0, 128], sizes = [8, 128], strides = [1, 1]} : vector<8x256xf32> to vector<8x128xf32>
    %cst_27 = arith.constant dense<0.000000e+00> : vector<8x256xf32>
    %28 = tpu.matmul %21, %12, %cst_27 {dimension_numbers = #tpu.dot_dimension_numbers<[1], [0], [0], [1], [0, 0, 1, 1], [], []>} : vector<8x128xf32>, vector<128x256xf32>, vector<8x256xf32> -> vector<8x256xf32>
    %cst_28 = arith.constant dense<0.000000e+00> : vector<8x128xf32>
    %29 = tpu.matmul %22, %13, %cst_28 {dimension_numbers = #tpu.dot_dimension_numbers<[1], [0], [0], [1], [0, 0, 1, 1], [], []>} : vector<8x128xf32>, vector<128x128xf32>, vector<8x128xf32> -> vector<8x128xf32>
    %30 = vector.extract_strided_slice %28 {offsets = [0, 0], sizes = [8, 128], strides = [1, 1]} : vector<8x256xf32> to vector<8x128xf32>
    %31 = arith.addf %26, %30 : vector<8x128xf32>
    %32 = arith.addf %31, %29 : vector<8x128xf32>
    %33 = math.tanh %32 : vector<8x128xf32>
    %cst_29 = arith.constant dense<0.000000e+00> : vector<8x256xf32>
    %34 = tpu.matmul %33, %14, %cst_29 {dimension_numbers = #tpu.dot_dimension_numbers<[1], [0], [0], [1], [0, 0, 1, 1], [], []>} : vector<8x128xf32>, vector<128x256xf32>, vector<8x256xf32> -> vector<8x256xf32>
    %35 = arith.addf %34, %17 : vector<8x256xf32>
    %36 = vector.extract_strided_slice %35 {offsets = [0, 0], sizes = [8, 128], strides = [1, 1]} : vector<8x256xf32> to vector<8x128xf32>
    %37 = vector.extract_strided_slice %35 {offsets = [0, 128], sizes = [8, 128], strides = [1, 1]} : vector<8x256xf32> to vector<8x128xf32>
    %38 = vector.extract_strided_slice %28 {offsets = [0, 128], sizes = [8, 128], strides = [1, 1]} : vector<8x256xf32> to vector<8x128xf32>
    %39 = arith.mulf %36, %38 : vector<8x128xf32>
    %40 = arith.mulf %37, %27 : vector<8x128xf32>
    %41 = arith.addf %39, %40 : vector<8x128xf32>
    %42 = arith.addf %41, %20 : vector<8x128xf32>
    %43 = math.tanh %42 : vector<8x128xf32>
    %44 = arith.index_cast %c0_i32_24 : i32 to index
    %c0_30 = arith.constant 0 : index
    %c0_31 = arith.constant 0 : index
    %45 = vector.load %arg9[%44, %c0_30, %c0_31] : memref<4x8x128xf32, #tpu.memory_space<vmem>>, vector<1x8x128xf32>
    %46 = vector.shape_cast %45 : vector<1x8x128xf32> to vector<8x128xf32>
    %47 = vector.shape_cast %43 : vector<8x128xf32> to vector<1x8x128xf32>
    tpu.vector_store %arg9[%44, %c0_30, %c0_31], %47 {strides = array<i32>} : memref<4x8x128xf32, #tpu.memory_space<vmem>>, vector<1x8x128xf32>,
    %c1_i32 = arith.constant 1 : i32
    %48 = arith.index_cast %c1_i32 : i32 to index
    %c0_32 = arith.constant 0 : index
    %c0_33 = arith.constant 0 : index
    %49 = vector.load %arg10[%48, %c0_32, %c0_33] : memref<4x8x256xf32, #tpu.memory_space<vmem>>, vector<1x8x256xf32>
    %50 = vector.shape_cast %49 : vector<1x8x256xf32> to vector<8x256xf32>
    %51 = vector.extract_strided_slice %50 {offsets = [0, 0], sizes = [8, 128], strides = [1, 1]} : vector<8x256xf32> to vector<8x128xf32>
    %52 = vector.extract_strided_slice %50 {offsets = [0, 128], sizes = [8, 128], strides = [1, 1]} : vector<8x256xf32> to vector<8x128xf32>
    %cst_34 = arith.constant dense<0.000000e+00> : vector<8x256xf32>
    %53 = tpu.matmul %43, %12, %cst_34 {dimension_numbers = #tpu.dot_dimension_numbers<[1], [0], [0], [1], [0, 0, 1, 1], [], []>} : vector<8x128xf32>, vector<128x256xf32>, vector<8x256xf32> -> vector<8x256xf32>
    %cst_35 = arith.constant dense<0.000000e+00> : vector<8x128xf32>
    %54 = tpu.matmul %33, %13, %cst_35 {dimension_numbers = #tpu.dot_dimension_numbers<[1], [0], [0], [1], [0, 0, 1, 1], [], []>} : vector<8x128xf32>, vector<128x128xf32>, vector<8x128xf32> -> vector<8x128xf32>
    %55 = vector.extract_strided_slice %53 {offsets = [0, 0], sizes = [8, 128], strides = [1, 1]} : vector<8x256xf32> to vector<8x128xf32>
    %56 = arith.addf %51, %55 : vector<8x128xf32>
    %57 = arith.addf %56, %54 : vector<8x128xf32>
    %58 = math.tanh %57 : vector<8x128xf32>
    %cst_36 = arith.constant dense<0.000000e+00> : vector<8x256xf32>
    %59 = tpu.matmul %58, %14, %cst_36 {dimension_numbers = #tpu.dot_dimension_numbers<[1], [0], [0], [1], [0, 0, 1, 1], [], []>} : vector<8x128xf32>, vector<128x256xf32>, vector<8x256xf32> -> vector<8x256xf32>
    %60 = arith.addf %59, %17 : vector<8x256xf32>
    %61 = vector.extract_strided_slice %60 {offsets = [0, 0], sizes = [8, 128], strides = [1, 1]} : vector<8x256xf32> to vector<8x128xf32>
    %62 = vector.extract_strided_slice %60 {offsets = [0, 128], sizes = [8, 128], strides = [1, 1]} : vector<8x256xf32> to vector<8x128xf32>
    %63 = vector.extract_strided_slice %53 {offsets = [0, 128], sizes = [8, 128], strides = [1, 1]} : vector<8x256xf32> to vector<8x128xf32>
    %64 = arith.mulf %61, %63 : vector<8x128xf32>
    %65 = arith.mulf %62, %52 : vector<8x128xf32>
    %66 = arith.addf %64, %65 : vector<8x128xf32>
    %67 = arith.addf %66, %20 : vector<8x128xf32>
    %68 = math.tanh %67 : vector<8x128xf32>
    %69 = arith.index_cast %c1_i32 : i32 to index
    %c0_37 = arith.constant 0 : index
    %c0_38 = arith.constant 0 : index
    %70 = vector.load %arg9[%69, %c0_37, %c0_38] : memref<4x8x128xf32, #tpu.memory_space<vmem>>, vector<1x8x128xf32>
    %71 = vector.shape_cast %70 : vector<1x8x128xf32> to vector<8x128xf32>
    %72 = vector.shape_cast %68 : vector<8x128xf32> to vector<1x8x128xf32>
    tpu.vector_store %arg9[%69, %c0_37, %c0_38], %72 {strides = array<i32>} : memref<4x8x128xf32, #tpu.memory_space<vmem>>, vector<1x8x128xf32>,
    %c2_i32 = arith.constant 2 : i32
    %73 = arith.index_cast %c2_i32 : i32 to index
    %c0_39 = arith.constant 0 : index
    %c0_40 = arith.constant 0 : index
    %74 = vector.load %arg10[%73, %c0_39, %c0_40] : memref<4x8x256xf32, #tpu.memory_space<vmem>>, vector<1x8x256xf32>
    %75 = vector.shape_cast %74 : vector<1x8x256xf32> to vector<8x256xf32>
    %76 = vector.extract_strided_slice %75 {offsets = [0, 0], sizes = [8, 128], strides = [1, 1]} : vector<8x256xf32> to vector<8x128xf32>
    %77 = vector.extract_strided_slice %75 {offsets = [0, 128], sizes = [8, 128], strides = [1, 1]} : vector<8x256xf32> to vector<8x128xf32>
    %cst_41 = arith.constant dense<0.000000e+00> : vector<8x256xf32>
    %78 = tpu.matmul %68, %12, %cst_41 {dimension_numbers = #tpu.dot_dimension_numbers<[1], [0], [0], [1], [0, 0, 1, 1], [], []>} : vector<8x128xf32>, vector<128x256xf32>, vector<8x256xf32> -> vector<8x256xf32>
    %cst_42 = arith.constant dense<0.000000e+00> : vector<8x128xf32>
    %79 = tpu.matmul %58, %13, %cst_42 {dimension_numbers = #tpu.dot_dimension_numbers<[1], [0], [0], [1], [0, 0, 1, 1], [], []>} : vector<8x128xf32>, vector<128x128xf32>, vector<8x128xf32> -> vector<8x128xf32>
    %80 = vector.extract_strided_slice %78 {offsets = [0, 0], sizes = [8, 128], strides = [1, 1]} : vector<8x256xf32> to vector<8x128xf32>
    %81 = arith.addf %76, %80 : vector<8x128xf32>
    %82 = arith.addf %81, %79 : vector<8x128xf32>
    %83 = math.tanh %82 : vector<8x128xf32>
    %cst_43 = arith.constant dense<0.000000e+00> : vector<8x256xf32>
    %84 = tpu.matmul %83, %14, %cst_43 {dimension_numbers = #tpu.dot_dimension_numbers<[1], [0], [0], [1], [0, 0, 1, 1], [], []>} : vector<8x128xf32>, vector<128x256xf32>, vector<8x256xf32> -> vector<8x256xf32>
    %85 = arith.addf %84, %17 : vector<8x256xf32>
    %86 = vector.extract_strided_slice %85 {offsets = [0, 0], sizes = [8, 128], strides = [1, 1]} : vector<8x256xf32> to vector<8x128xf32>
    %87 = vector.extract_strided_slice %85 {offsets = [0, 128], sizes = [8, 128], strides = [1, 1]} : vector<8x256xf32> to vector<8x128xf32>
    %88 = vector.extract_strided_slice %78 {offsets = [0, 128], sizes = [8, 128], strides = [1, 1]} : vector<8x256xf32> to vector<8x128xf32>
    %89 = arith.mulf %86, %88 : vector<8x128xf32>
    %90 = arith.mulf %87, %77 : vector<8x128xf32>
    %91 = arith.addf %89, %90 : vector<8x128xf32>
    %92 = arith.addf %91, %20 : vector<8x128xf32>
    %93 = math.tanh %92 : vector<8x128xf32>
    %94 = arith.index_cast %c2_i32 : i32 to index
    %c0_44 = arith.constant 0 : index
    %c0_45 = arith.constant 0 : index
    %95 = vector.load %arg9[%94, %c0_44, %c0_45] : memref<4x8x128xf32, #tpu.memory_space<vmem>>, vector<1x8x128xf32>
    %96 = vector.shape_cast %95 : vector<1x8x128xf32> to vector<8x128xf32>
    %97 = vector.shape_cast %93 : vector<8x128xf32> to vector<1x8x128xf32>
    tpu.vector_store %arg9[%94, %c0_44, %c0_45], %97 {strides = array<i32>} : memref<4x8x128xf32, #tpu.memory_space<vmem>>, vector<1x8x128xf32>,
    %c3_i32 = arith.constant 3 : i32
    %98 = arith.index_cast %c3_i32 : i32 to index
    %c0_46 = arith.constant 0 : index
    %c0_47 = arith.constant 0 : index
    %99 = vector.load %arg10[%98, %c0_46, %c0_47] : memref<4x8x256xf32, #tpu.memory_space<vmem>>, vector<1x8x256xf32>
    %100 = vector.shape_cast %99 : vector<1x8x256xf32> to vector<8x256xf32>
    %101 = vector.extract_strided_slice %100 {offsets = [0, 0], sizes = [8, 128], strides = [1, 1]} : vector<8x256xf32> to vector<8x128xf32>
    %102 = vector.extract_strided_slice %100 {offsets = [0, 128], sizes = [8, 128], strides = [1, 1]} : vector<8x256xf32> to vector<8x128xf32>
    %cst_48 = arith.constant dense<0.000000e+00> : vector<8x256xf32>
    %103 = tpu.matmul %93, %12, %cst_48 {dimension_numbers = #tpu.dot_dimension_numbers<[1], [0], [0], [1], [0, 0, 1, 1], [], []>} : vector<8x128xf32>, vector<128x256xf32>, vector<8x256xf32> -> vector<8x256xf32>
    %cst_49 = arith.constant dense<0.000000e+00> : vector<8x128xf32>
    %104 = tpu.matmul %83, %13, %cst_49 {dimension_numbers = #tpu.dot_dimension_numbers<[1], [0], [0], [1], [0, 0, 1, 1], [], []>} : vector<8x128xf32>, vector<128x128xf32>, vector<8x128xf32> -> vector<8x128xf32>
    %105 = vector.extract_strided_slice %103 {offsets = [0, 0], sizes = [8, 128], strides = [1, 1]} : vector<8x256xf32> to vector<8x128xf32>
    %106 = arith.addf %101, %105 : vector<8x128xf32>
    %107 = arith.addf %106, %104 : vector<8x128xf32>
    %108 = math.tanh %107 : vector<8x128xf32>
    %cst_50 = arith.constant dense<0.000000e+00> : vector<8x256xf32>
    %109 = tpu.matmul %108, %14, %cst_50 {dimension_numbers = #tpu.dot_dimension_numbers<[1], [0], [0], [1], [0, 0, 1, 1], [], []>} : vector<8x128xf32>, vector<128x256xf32>, vector<8x256xf32> -> vector<8x256xf32>
    %110 = arith.addf %109, %17 : vector<8x256xf32>
    %111 = vector.extract_strided_slice %110 {offsets = [0, 0], sizes = [8, 128], strides = [1, 1]} : vector<8x256xf32> to vector<8x128xf32>
    %112 = vector.extract_strided_slice %110 {offsets = [0, 128], sizes = [8, 128], strides = [1, 1]} : vector<8x256xf32> to vector<8x128xf32>
    %113 = vector.extract_strided_slice %103 {offsets = [0, 128], sizes = [8, 128], strides = [1, 1]} : vector<8x256xf32> to vector<8x128xf32>
    %114 = arith.mulf %111, %113 : vector<8x128xf32>
    %115 = arith.mulf %112, %102 : vector<8x128xf32>
    %116 = arith.addf %114, %115 : vector<8x128xf32>
    %117 = arith.addf %116, %20 : vector<8x128xf32>
    %118 = math.tanh %117 : vector<8x128xf32>
    %119 = arith.index_cast %c3_i32 : i32 to index
    %c0_51 = arith.constant 0 : index
    %c0_52 = arith.constant 0 : index
    %120 = vector.load %arg9[%119, %c0_51, %c0_52] : memref<4x8x128xf32, #tpu.memory_space<vmem>>, vector<1x8x128xf32>
    %121 = vector.shape_cast %120 : vector<1x8x128xf32> to vector<8x128xf32>
    %122 = vector.shape_cast %118 : vector<8x128xf32> to vector<1x8x128xf32>
    tpu.vector_store %arg9[%119, %c0_51, %c0_52], %122 {strides = array<i32>} : memref<4x8x128xf32, #tpu.memory_space<vmem>>, vector<1x8x128xf32>,
    %c4_i32 = arith.constant 4 : i32
    %c0_53 = arith.constant 0 : index
    %c0_54 = arith.constant 0 : index
    %123 = vector.load %arg11[%c0_53, %c0_54] : memref<8x128xf32, #tpu.memory_space<vmem>>, vector<8x128xf32>
    tpu.vector_store %arg11[%c0_53, %c0_54], %118 {strides = array<i32>} : memref<8x128xf32, #tpu.memory_space<vmem>>, vector<8x128xf32>,
    %c0_55 = arith.constant 0 : index
    %c0_56 = arith.constant 0 : index
    %124 = vector.load %arg12[%c0_55, %c0_56] : memref<8x128xf32, #tpu.memory_space<vmem>>, vector<8x128xf32>
    tpu.vector_store %arg12[%c0_55, %c0_56], %108 {strides = array<i32>} : memref<8x128xf32, #tpu.memory_space<vmem>>, vector<8x128xf32>,
    return
  }
  func.func @transform_0(%arg0: i32) -> (i32, i32, i32) {
    %c0_i32 = arith.constant 0 : i32
    %c0_i32_0 = arith.constant 0 : i32
    %c0_i32_1 = arith.constant 0 : i32
    return %arg0, %c0_i32, %c0_i32_0 : i32, i32, i32
  }
  func.func @transform_1(%arg0: i32) -> (i32, i32) {
    %c0_i32 = arith.constant 0 : i32
    %c0_i32_0 = arith.constant 0 : i32
    %c0_i32_1 = arith.constant 0 : i32
    return %c0_i32, %c0_i32_0 : i32, i32
  }
  func.func @transform_2(%arg0: i32) -> (i32, i32) {
    %c0_i32 = arith.constant 0 : i32
    %c0_i32_0 = arith.constant 0 : i32
    %c0_i32_1 = arith.constant 0 : i32
    return %c0_i32, %c0_i32_0 : i32, i32
  }
  func.func @transform_3(%arg0: i32) -> (i32, i32) {
    %c0_i32 = arith.constant 0 : i32
    %c0_i32_0 = arith.constant 0 : i32
    %c0_i32_1 = arith.constant 0 : i32
    return %c0_i32, %c0_i32_0 : i32, i32
  }
  func.func @transform_4(%arg0: i32) -> (i32, i32) {
    %c0_i32 = arith.constant 0 : i32
    %c0_i32_0 = arith.constant 0 : i32
    %c0_i32_1 = arith.constant 0 : i32
    return %c0_i32, %c0_i32_0 : i32, i32
  }
  func.func @transform_5(%arg0: i32) -> (i32, i32) {
    %c0_i32 = arith.constant 0 : i32
    %c0_i32_0 = arith.constant 0 : i32
    %c0_i32_1 = arith.constant 0 : i32
    return %c0_i32, %c0_i32_0 : i32, i32
  }
  func.func @transform_6(%arg0: i32) -> (i32, i32) {
    %c0_i32 = arith.constant 0 : i32
    %c0_i32_0 = arith.constant 0 : i32
    %c0_i32_1 = arith.constant 0 : i32
    return %c0_i32, %c0_i32_0 : i32, i32
  }
  func.func @transform_7(%arg0: i32) -> (i32, i32) {
    %c0_i32 = arith.constant 0 : i32
    %c0_i32_0 = arith.constant 0 : i32
    %c0_i32_1 = arith.constant 0 : i32
    return %c0_i32, %c0_i32_0 : i32, i32
  }
  func.func @transform_8(%arg0: i32) -> (i32, i32, i32) {
    %c0_i32 = arith.constant 0 : i32
    %c0_i32_0 = arith.constant 0 : i32
    %c0_i32_1 = arith.constant 0 : i32
    return %arg0, %c0_i32, %c0_i32_0 : i32, i32, i32
  }
}

</mosaic_0001>

<bundles_post_ra>
// kernel: tpu_custom_call.1
= control target key start
LH: loop header
LB: loop body
LE: loop exit
PB: predicated region body
PF: predicated region fallthrough
CT: control target
= control target key end

     0   :  { %s3337_s0 = inlined_call_operand.hbm [shape: f32[8,8,128], index: 0, kind: input, shape index: {}]   ;;  %s3338_s1 = inlined_call_operand.hbm [shape: f32[128,256], index: 1, kind: input, shape index: {}]   ;;  %s3339_s2 = inlined_call_operand.vmem [shape: f32[1,256], index: 2, kind: input, shape index: {}]   ;;  %s3340_s3 = inlined_call_operand.hbm [shape: f32[128,256], index: 3, kind: input, shape index: {}]   ;;  %s3341_s4 = inlined_call_operand.hbm [shape: f32[128,128], index: 4, kind: input, shape index: {}]   ;;  %s3342_s5 = inlined_call_operand.hbm [shape: f32[128,256], index: 5, kind: input, shape index: {}]   ;;  %s3343_s6 = inlined_call_operand.vmem [shape: f32[1,256], index: 6, kind: input, shape index: {}]   ;;  %s3344_s7 = inlined_call_operand.vmem [shape: f32[1,128], index: 7, kind: input, shape index: {}]   ;;  %s3345_s8 = inlined_call_operand.hbm [shape: f32[8,8,128], index: 8, kind: output, shape index: {}]  }
   0x1   :  { %3358 = sst [smem:[#allocation20_spill]] %s3338_s1 }
   0x2   :  { %13 = vsyncpa [#allocation6], 0 }
   0x3   :  { %15 = vsyncpa [#allocation6 + $0x1], 0 }
   0x4   :  { %16 = vsyncpa [#allocation9], 0 }
   0x5   :  { %17 = vsyncpa [#allocation12], 0 }
   0x6   :  { %18 = vsyncpa [#allocation7], 0 }
   0x7   :  { %20 = vsyncpa [#allocation7 + $0x1], 0  ;;  %s2674_s27 = smov 0   ;;  %s2676_s28 = smov 0  }
   0x8   :  { %s2678_s29 = smov 0   ;;  %s2680_s30 = smov 0  }
   0x9 LB: > { %s2695_s9 = sadd.s32 4294967295, %s2611_s30   ;;  %s1661_s10 = sadd.s32 4294967294, %s2611_s30   ;;  %s2611_s30 = sphi %s2680_s30, %s3387_s30   ;;  %s2607_s29 = sphi %s2678_s29, %s3386_s29   ;;  %s2603_s28 = sphi %s2676_s28, %s3385_s28   ;;  %s2599_s27 = sphi %s2674_s27, %s3384_s27  }
   0xa   : > { %p46_p0 = scmp.ne.s32.totalorder %s2603_s28, %s2599_s27  ;;  %p3346_p1 = scmp.eq.s32.totalorder %s2695_s9, 0 }
   0xb   : > { %p223_p3 = scmp.eq.s32.totalorder %s1661_s10, 1  ;;  %p1662_p5 = scmp.ge.s32.totalorder %s2611_s30, 1 }
   0xc   : > { %p2704_p4 = por %p3346_p1, %p46_p0  ;;  %p230_p7 = scmp.lt.s32.totalorder %s2611_s30, 3 }
   0xd   : > { %p2709_p6 = por %p223_p3, %p46_p0  ;;  %s2613_s14 = smov [#allocation8]  }
   0xe   : > { %s3359_s11 = scalar_select %p2704_p4, 1, 0 }
   0xf   : > { %s3360_s12 = scalar_select %p2709_p6, 1, 0 }
  0x10   : > { %p2715_p9 = pnand %p1662_p5, %p230_p7  ;;  %s242_s15 = sshll.u32 %s2613_s14, 4  ;;  %s2719_s15 = int_to_ptr.vmem [resolvable:$true] %s242_s15 }
  0x11   : > { %3361 = sst [smem:[#allocation19_spill]] %s3360_s12  ;;  %s2614_s17 = smov [#allocation11]  }
  0x12   : > { %s3362_s13 = scalar_select %p2715_p9, 1, 0 }
  0x13   : > { %p2302_p10 = pneg %p2715_p9  ;;  %s271_s18 = sshll.u32 %s2614_s17, 4  ;;  %s2730_s18 = int_to_ptr.vmem [resolvable:$true] %s271_s18 }
  0x14   : > { %s3364_s1 = sld [smem:[#allocation20_spill]] }
  0x15   : > { %p2726_p12 = pnand %p2302_p10, %p3346_p1 }
  0x17   : > { %p2740_p0 = pneg %p2726_p12 }
  0x1a   : > { %s2395_s21 = scalar_lea.hbm %s3364_s1, 4096 }
  0x1b   : > { %p2396_p13 = scmp.ne.s32.totalorder %s3364_s1, %s2395_s21  ;;  %p2402_p7 = scmp.lt.u32.totalorder %s2395_s21, %s3364_s1 }
  0x1d   : > { %p2398_p3 = pnand %p2740_p0, %p2396_p13 }
  0x1f   : > { %p2399_p5 = pneg %p2398_p3 }
  0x21   : > { %p2404_p10 = pnand %p2402_p7, %p2399_p5 }
  0x23   : > { %2407 = shalt.err (!%p2404_p10)
}
  0x24   : > { %s2408_s10 = scalar_lea.vmem %s2719_s15, 4096  ;;  %p2416_p2 = scmp.lt.s32.totalorder %s2719_s15, %s2719_s15 }
  0x25   : > { %p2409_p11 = scmp.ne.s32.totalorder %s2719_s15, %s2408_s10  ;;  %p2417_p6 = scmp.lt.s32.totalorder %s2408_s10, %s2408_s10 }
  0x27   : > { %p2411_p8 = pnand %p2409_p11, %p2740_p0  ;;  %p2418_p13 = por %p2417_p6, %p2416_p2 }
  0x29   : > { %p2412_p1 = pneg %p2411_p8 }
  0x2b   : > { %p2419_p3 = pnand %p2418_p13, %p2412_p1 }
  0x2d   : > { %2422 = shalt.err (!%p2419_p3)
}
  0x2e   : > { %s3348_s14 = smov 256   ;;  %s3350_s17 = smov 16  }
  0x2f   : > { %2305 = dma.hbm_to_vmem [thread:$0]  (!%p2726_p12), %s3364_s1, 4096, %s2719_s15, [#allocation9], %s3348_s14, %s3348_s14, %s3350_s17  }
  0x30   : > { %s2423_s23 = scalar_lea.hbm %s3341_s4, 2048 }
  0x31   : > { %p2424_p1 = scmp.ne.s32.totalorder %s3341_s4, %s2423_s23  ;;  %p2430_p8 = scmp.lt.u32.totalorder %s2423_s23, %s3341_s4 }
  0x33   : > { %p2426_p2 = pnand %p2424_p1, %p2740_p0 }
  0x35   : > { %p2427_p6 = pneg %p2426_p2 }
  0x37   : > { %p2432_p11 = pnand %p2430_p8, %p2427_p6 }
  0x39   : > { %2435 = shalt.err (!%p2432_p11)
}
  0x3a   : > { %s2436_s15 = scalar_lea.vmem %s2730_s18, 2048  ;;  %p2444_p13 = scmp.lt.s32.totalorder %s2730_s18, %s2730_s18 }
  0x3b   : > { %p2437_p5 = scmp.ne.s32.totalorder %s2730_s18, %s2436_s15  ;;  %p2445_p3 = scmp.lt.s32.totalorder %s2436_s15, %s2436_s15 }
  0x3d   : > { %p2439_p7 = pnand %p2437_p5, %p2740_p0  ;;  %p2446_p1 = por %p2445_p3, %p2444_p13 }
  0x3f   : > { %p2440_p10 = pneg %p2439_p7 }
  0x41   : > { %p2447_p2 = pnand %p2446_p1, %p2440_p10 }
  0x43   : > { %2450 = shalt.err (!%p2447_p2)
}
  0x44   : > { %s3354_s19 = smov 128   ;;  %s2618_s12 = smov 8  }
  0x45   : > { %2311 = dma.hbm_to_vmem [thread:$0]  (!%p2726_p12), %s3341_s4, 2048, %s2730_s18, [#allocation12], %s3354_s19, %s3354_s19, %s2618_s12  }
  0x46   : > { %s2619_s22 = smov [#allocation10]   ;;  %s2620_s25 = smov [#allocation13]  }
  0x47   : > { %s258_s23 = sshll.u32 %s2619_s22, 4  ;;  %s284_s26 = sshll.u32 %s2620_s25, 4  ;;  %s259_s23 = int_to_ptr.vmem [resolvable:$true] %s258_s23  ;;  %s2790_s26 = int_to_ptr.vmem [resolvable:$true] %s284_s26 }
  0x48   : > { %s2451_s14 = scalar_lea.hbm %s3340_s3, 4096 }
  0x49   : > { %p2452_p6 = scmp.ne.s32.totalorder %s3340_s3, %s2451_s14  ;;  %p2458_p5 = scmp.lt.u32.totalorder %s2451_s14, %s3340_s3 }
  0x4b   : > { %p2454_p8 = pnand %p2452_p6, %p2740_p0 }
  0x4d   : > { %p2455_p11 = pneg %p2454_p8 }
  0x4f   : > { %p2460_p7 = pnand %p2458_p5, %p2455_p11 }
  0x51   : > { %2463 = shalt.err (!%p2460_p7)
}
  0x52   : > { %s2464_s21 = scalar_lea.vmem %s259_s23, 4096  ;;  %p2472_p1 = scmp.lt.s32.totalorder %s259_s23, %s259_s23 }
  0x53   : > { %p2465_p10 = scmp.ne.s32.totalorder %s259_s23, %s2464_s21  ;;  %p2473_p2 = scmp.lt.s32.totalorder %s2464_s21, %s2464_s21 }
  0x55   : > { %p2467_p13 = pnand %p2465_p10, %p2740_p0  ;;  %p2474_p4 = por %p2473_p2, %p2472_p1 }
  0x57   : > { %p2468_p3 = pneg %p2467_p13 }
  0x59   : > { %p2475_p9 = pnand %p2474_p4, %p2468_p3 }
  0x5b   : > { %2478 = shalt.err (!%p2475_p9)
}
  0x5c   : > { %s3366_s1 = smov 16   ;;  %s3367_s17 = smov 256  }
  0x5d   : > { %2308 = dma.hbm_to_vmem [thread:$0]  (!%p2726_p12), %s3340_s3, 4096, %s259_s23, [#allocation9], %s3367_s17, %s3367_s17, %s3366_s1  }
  0x5e   : > { %s2479_s15 = scalar_lea.hbm %s3342_s5, 4096 }
  0x5f   : > { %p2480_p6 = scmp.ne.s32.totalorder %s3342_s5, %s2479_s15  ;;  %p2486_p8 = scmp.lt.u32.totalorder %s2479_s15, %s3342_s5 }
  0x61   : > { %p2482_p4 = pnand %p2480_p6, %p2740_p0 }
  0x63   : > { %p2483_p9 = pneg %p2482_p4 }
  0x65   : > { %p2488_p11 = pnand %p2486_p8, %p2483_p9 }
  0x67   : > { %2491 = shalt.err (!%p2488_p11)
}
  0x68   : > { %s2492_s23 = scalar_lea.vmem %s2790_s26, 4096  ;;  %p2500_p13 = scmp.lt.s32.totalorder %s2790_s26, %s2790_s26 }
  0x69   : > { %p2493_p5 = scmp.ne.s32.totalorder %s2790_s26, %s2492_s23  ;;  %p2501_p3 = scmp.lt.s32.totalorder %s2492_s23, %s2492_s23 }
  0x6b   : > { %p2495_p7 = pnand %p2493_p5, %p2740_p0  ;;  %p2502_p1 = por %p2501_p3, %p2500_p13 }
  0x6d   : > { %p2496_p10 = pneg %p2495_p7 }
  0x6f   : > { %p2503_p2 = pnand %p2502_p1, %p2496_p10 }
  0x71   : > { %2506 = shalt.err (!%p2503_p2)
}
  0x72   : > { %2314 = dma.hbm_to_vmem [thread:$0]  (!%p2726_p12), %s3342_s5, 4096, %s2790_s26, [#allocation12], %s3367_s17, %s3367_s17, %s3366_s1  }
  0x73   : > { %s2840_s16 = sadd.s32 1, %s2611_s30   ;;  %s33_s14 = sadd.s32 1, %s2607_s29 }
  0x74   : > { %s30_s24 = ssub.s32 %s2611_s30, %s2840_s16  ;;  %p40_p6 = scmp.ne.s32.totalorder %s2607_s29, %s2603_s28 }
  0x75   : > { %p31_p0 = scmp.eq.s32.totalorder %s30_s24, 0  ;;  %p41_p4 = scmp.eq.s32.totalorder %s2611_s30, 0 }
  0x76   : > { %p3368_p8 = scmp.eq.s32.totalorder %s2695_s9, 1  ;;  %p2327_p5 = scmp.lt.s32.totalorder %s2611_s30, 2 }
  0x77   : > { %s2849_s25 = scalar_select %p31_p0, %s2607_s29, %s33_s14  }
  0x78   : > { %p42_p9 = por %p41_p4, %p40_p6  ;;  %p2853_p11 = por %p3368_p8, %p40_p6 }
  0x79   : > { %s304_s15 = sand.u32 1, %s2607_s29   ;;  %s1688_s26 = sshll.u32 %s2611_s30, 9 }
  0x7a   : > { %s1668_s20 = sshll.u32 %s304_s15, 5  ;;  %s2863_s18 = scalar_lea.hbm %s3337_s0, %s1688_s26 }
  0x7b   : > { %s308_s21 = scalar_lea.vmem [#allocation5], %s1668_s20  ;;  %p2867_p12 = pnand %p2327_p5, %p42_p9 }
  0x7c   : > { %s315_s23 = sshll.u32 %s308_s21, 4  ;;  %s2871_s22 = scalar_lea.sflag [#allocation6], %s304_s15  ;;  %s2865_s23 = int_to_ptr.vmem [resolvable:$true] %s315_s23 }
  0x7d   : > { %s2507_s24 = scalar_lea.hbm %s2863_s18, 512  ;;  %p2509_p10 = pneg %p2867_p12 }
  0x7e   : > { %p2508_p7 = scmp.ne.s32.totalorder %s2863_s18, %s2507_s24  ;;  %s2512_s26 = scalar_lea.hbm %s3337_s0, 1024 }
  0x7f   : > { %p2513_p1 = scmp.lt.u32.totalorder %s2863_s18, %s3337_s0  ;;  %p2514_p2 = scmp.lt.u32.totalorder %s2512_s26, %s2507_s24 }
  0x80   : > { %p2510_p13 = pnand %p2509_p10, %p2508_p7  ;;  %p2516_p6 = scmp.lt.u32.totalorder %s2507_s24, %s2863_s18 }
  0x81   : > { %p2515_p0 = por %p2514_p2, %p2513_p1 }
  0x82   : > { %p2511_p3 = pneg %p2510_p13 }
  0x83   : > { %p2517_p4 = por %p2516_p6, %p2515_p0 }
  0x85   : > { %p2518_p9 = pnand %p2517_p4, %p2511_p3 }
  0x87   : > { %2521 = shalt.err (!%p2518_p9)
}
  0x88   : > { %s2522_s15 = scalar_lea.vmem %s2865_s23, 512  ;;  %s2621_s21 = smov [#allocation5]  }
  0x89   : > { %p2523_p8 = scmp.ne.s32.totalorder %s2865_s23, %s2522_s15  ;;  %s2527_s14 = sshll.u32 %s2621_s21, 4  ;;  %s2528_s14 = int_to_ptr.vmem [resolvable:$false] %s2527_s14 }
  0x8a   : > { %s2529_s20 = scalar_lea.vmem %s2528_s14, 1024  ;;  %p2530_p13 = scmp.lt.s32.totalorder %s2865_s23, %s2528_s14 }
  0x8b   : > { %p2525_p5 = pnand %p2523_p8, %p2509_p10  ;;  %p2531_p1 = scmp.lt.s32.totalorder %s2529_s20, %s2522_s15 }
  0x8d   : > { %p2526_p7 = pneg %p2525_p5  ;;  %p2532_p2 = por %p2531_p1, %p2530_p13 }
  0x8f   : > { %p2533_p0 = pnand %p2532_p2, %p2526_p7 }
  0x91   : > { %2536 = shalt.err (!%p2533_p0)
}
  0x92   : > { %s3371_s24 = smov 128   ;;  %p3372_p10 = scmp.ne.s32.totalorder %s3362_s13, 0 }
  0x93   : > { %2318 = dma.hbm_to_vmem [thread:$0]  (!%p2867_p12), %s2863_s18, 512, %s2865_s23, %s2871_s22, %s3371_s24, %s3371_s24, %s2618_s12  }
  0x94   : > { %327 = sbr.rel (%p3372_p10) target bundleno = 2088 (0x828), region = 52  ;;  %s2905_s26 = sand.u32 (!%p3372_p10), 1, %s2603_s28  }
  0x95   : > { %s1672_s1 = sshll.u32 (!%p3372_p10), %s2905_s26, 5  ;;  %s330_s17 = scalar_lea.sflag (!%p3372_p10), [#allocation6], %s2905_s26 }
  0x96   : > { %s2909_s15 = scalar_lea.vmem (!%p3372_p10), [#allocation5], %s1672_s1  ;;  %p3373_p3 = scmp.ne.s32.totalorder (!%p3372_p10), %s3359_s11, 0 }
  0x9b   : > { %2582 = dma.done.wait (%p3373_p3), %s330_s17, 512  }
  0x9c   : > { %2584 = vsyncadd (%p3373_p3), %s330_s17, 4294966784  ;;  %p3374_p12 = scmp.eq.s32.totalorder %s2695_s9, 0 }
  0x9e   : > { %2586 = dma.done.wait (%p3374_p12), [#allocation9], 8192   ;;  %p3375_p6 = pmov %p3374_p12 }
  0xa0   : > { %2588 = vsyncadd (%p3375_p6), [#allocation9], 4294959104  ;;  %p3376_p4 = pmov %p3375_p6 }
  0xa2   : > { %2590 = dma.done.wait (%p3376_p4), [#allocation12], 6144   ;;  %p3377_p9 = pmov %p3376_p4 }
  0xa3   : > { %s2923_s13 = scalar_lea.vmem [#allocation14], %s1672_s1  ;;  %p3378_p8 = scmp.ne.s32.totalorder %s2695_s9, 0 }
  0xa4   : > { %2592 = vsyncadd (%p3377_p9), [#allocation12], 4294961152  ;;  %v2622_v0 = vmov (!%p3378_p8), 0.0  }
  0xa5   : > { %387 = sbr.rel (%p3378_p8) target bundleno = 172 (0xac), region = 76  ;;  %388 = vst [vmem:[#allocation3] sm:$0xff] (!%p3378_p8), %v2622_v0  ;;  %389 = vst [vmem:[#allocation4] sm:$0xff] (!%p3378_p8), %v2622_v0 }
  0xac PF: > { %v395_v1 = vld [vmem:[#allocation8 + $0x8] sm:$0xff]  ;;  %v397_v2 = vld [vmem:[#allocation8 + $0x18] sm:$0xff]  ;;  %v394_v3 = vld [vmem:[#allocation8] sm:$0xff]  ;;  %v2623_v8 = vmov 0.0   ;;  %vm2625_vm0 = vmmov 0   ;;  %s1689_s21 = sshll.u32 %s2695_s9, 9 }
  0xad   : > { %v1898_v4 = vpack.c.bf16 %v397_v2, %v395_v1  ;;  %v396_v5 = vld [vmem:[#allocation8 + $0x10] sm:$0xff]  ;;  %v536_v6 = vld [vmem:[#allocation10 + $0x8] sm:$0xff]  ;;  %v538_v7 = vld [vmem:[#allocation10 + $0x18] sm:$0xff]  ;;  %502 = vmatprep.mubr.f32.mxu0 %v2623_v8  ;;  %702 = vmatprep.mubr.f32.mxu1 %v2623_v8  ;;  %s1550_s14 = sshll.u32 %s2923_s13, 4  ;;  %s3290_s1 = scalar_lea.hbm %s3345_s8, %s1689_s21  ;;  %s3292_s14 = int_to_ptr.vmem [resolvable:$true] %s1550_s14 }
  0xae   : > { %v1900_v9 = vpack.c.bf16 %v396_v5, %v394_v3  ;;  %v2929_v10 = vpack.c.bf16 %v538_v7, %v536_v6  ;;  %v399_v11 = vld [vmem:[#allocation8 + $0x28] sm:$0xff]  ;;  %v401_v12 = vld [vmem:[#allocation8 + $0x38] sm:$0xff]  ;;  %v535_v13 = vld [vmem:[#allocation10] sm:$0xff]  ;;  %s1537_s17 = scalar_lea.sflag [#allocation7], %s2905_s26  ;;  %s2626_s9 = smov [#allocation14]  }
  0xaf   : > { %1899 = vmatprep.subr.bf16.mxu0 %v1898_v4  ;;  %v1902_v14 = vpack.c.bf16 %v401_v12, %v399_v11  ;;  %v537_v15 = vld [vmem:[#allocation10 + $0x10] sm:$0xff]  ;;  %v398_v16 = vld [vmem:[#allocation8 + $0x20] sm:$0xff]  ;;  %v540_v20 = vld [vmem:[#allocation10 + $0x28] sm:$0xff]  ;;  %s2541_s11 = sshll.u32 %s2626_s9, 4  ;;  %s2542_s11 = int_to_ptr.vmem [resolvable:$false] %s2541_s11 }
  0xb0   : > { %v400_v17 = vld [vmem:[#allocation8 + $0x30] sm:$0xff]  ;;  %1901 = vmatpush1.bf16.msra.mxu0 %v1900_v9  ;;  %1931 = vmatprep.subr.bf16.mxu1 %v2929_v10  ;;  %v2932_v18 = vpack.c.bf16 %v537_v15, %v535_v13  ;;  %v542_v21 = vld [vmem:[#allocation10 + $0x38] sm:$0xff]  ;;  %v403_v22 = vld [vmem:[#allocation8 + $0x48] sm:$0xff]  ;;  %s2543_s12 = scalar_lea.vmem %s2542_s11, 1024  ;;  %p2544_p1 = scmp.lt.s32.totalorder %s3292_s14, %s2542_s11 }
  0xb1   : > { %v1904_v19 = vpack.c.bf16 %v400_v17, %v398_v16  ;;  %1903 = vmatprep.subr.bf16.mxu0 %v1902_v14  ;;  %v2934_v23 = vpack.c.bf16 %v542_v21, %v540_v20  ;;  %v405_v24 = vld [vmem:[#allocation8 + $0x58] sm:$0xff]  ;;  %v539_v25 = vld [vmem:[#allocation10 + $0x20] sm:$0xff]  ;;  %v541_v26 = vld [vmem:[#allocation10 + $0x30] sm:$0xff] }
  0xb2   : > { %1933 = vmatpush1.bf16.msra.mxu1 %v2932_v18  ;;  %v1906_v27 = vpack.c.bf16 %v405_v24, %v403_v22  ;;  %v2937_v28 = vpack.c.bf16 %v541_v26, %v539_v25  ;;  %v402_v29 = vld [vmem:[#allocation8 + $0x40] sm:$0xff]  ;;  %v404_v30 = vld [vmem:[#allocation8 + $0x50] sm:$0xff]  ;;  %v544_v31 = vld [vmem:[#allocation10 + $0x48] sm:$0xff] }
  0xb3   : > { %1935 = vmatprep.subr.bf16.mxu1 %v2934_v23  ;;  %v546_v32 = vld [vmem:[#allocation10 + $0x58] sm:$0xff]  ;;  %v407_v33 = vld [vmem:[#allocation8 + $0x68] sm:$0xff]  ;;  %v1908_v35 = vpack.c.bf16 %v404_v30, %v402_v29  ;;  %v543_v37 = vld [vmem:[#allocation10 + $0x40] sm:$0xff] }
  0xb4   : > { %v409_v34 = vld [vmem:[#allocation8 + $0x78] sm:$0xff]  ;;  %1905 = vmatpush1.bf16.msra.mxu0 %v1904_v19  ;;  %v2940_v36 = vpack.c.bf16 %v546_v32, %v544_v31  ;;  %v545_v38 = vld [vmem:[#allocation10 + $0x50] sm:$0xff]  ;;  %v406_v39 = vld [vmem:[#allocation8 + $0x60] sm:$0xff] }
  0xb5   : > { %1907 = vmatprep.subr.bf16.mxu0 %v1906_v27  ;;  %v1910_v40 = vpack.c.bf16 %v409_v34, %v407_v33  ;;  %v408_v41 = vld [vmem:[#allocation8 + $0x70] sm:$0xff]  ;;  %v548_v42 = vld [vmem:[#allocation10 + $0x68] sm:$0xff]  ;;  %v550_v43 = vld [vmem:[#allocation10 + $0x78] sm:$0xff]  ;;  %v2943_v44 = vpack.c.bf16 %v545_v38, %v543_v37 }
  0xb6   : > { %1937 = vmatpush1.bf16.msra.mxu1 %v2937_v28  ;;  %v411_v45 = vld [vmem:[#allocation8 + $0x88] sm:$0xff]  ;;  %v413_v46 = vld [vmem:[#allocation8 + $0x98] sm:$0xff]  ;;  %v2946_v47 = vpack.c.bf16 %v550_v43, %v548_v42  ;;  %v547_v48 = vld [vmem:[#allocation10 + $0x60] sm:$0xff]  ;;  %v1912_v50 = vpack.c.bf16 %v408_v41, %v406_v39 }
  0xb7   : > { %1939 = vmatprep.subr.bf16.mxu1 %v2940_v36  ;;  %v549_v49 = vld [vmem:[#allocation10 + $0x70] sm:$0xff]  ;;  %v552_v51 = vld [vmem:[#allocation10 + $0x88] sm:$0xff]  ;;  %v554_v52 = vld [vmem:[#allocation10 + $0x98] sm:$0xff]  ;;  %v1914_v53 = vpack.c.bf16 %v413_v46, %v411_v45  ;;  %v3356_v45 = vmov 0.0|0.0  }
  0xb8   : > { %1909 = vmatpush1.bf16.msra.mxu0 %v1908_v35  ;;  %v410_v54 = vld [vmem:[#allocation8 + $0x80] sm:$0xff]  ;;  %v412_v55 = vld [vmem:[#allocation8 + $0x90] sm:$0xff]  ;;  %v2949_v56 = vpack.c.bf16 %v549_v49, %v547_v48  ;;  %v415_v57 = vld [vmem:[#allocation8 + $0xa8] sm:$0xff]  ;;  %v2952_v59 = vpack.c.bf16 %v554_v52, %v552_v51 }
  0xb9   : > { %1911 = vmatprep.subr.bf16.mxu0 %v1910_v40  ;;  %v417_v58 = vld [vmem:[#allocation8 + $0xb8] sm:$0xff]  ;;  %v551_v60 = vld [vmem:[#allocation10 + $0x80] sm:$0xff]  ;;  %v553_v61 = vld [vmem:[#allocation10 + $0x90] sm:$0xff]  ;;  %v1916_v62 = vpack.c.bf16 %v412_v55, %v410_v54 }
  0xba   : > { %1941 = vmatpush1.bf16.msra.mxu1 %v2943_v44  ;;  %v556_v63 = vld [vmem:[#allocation10 + $0xa8] sm:$0xff]  ;;  %v558_v0 = vld [vmem:[#allocation10 + $0xb8] sm:$0xff]  ;;  %v1918_v1 = vpack.c.bf16 %v417_v58, %v415_v57  ;;  %v414_v2 = vld [vmem:[#allocation8 + $0xa0] sm:$0xff]  ;;  %v2955_v4 = vpack.c.bf16 %v553_v61, %v551_v60 }
  0xbb   : > { %1943 = vmatprep.subr.bf16.mxu1 %v2946_v47  ;;  %v416_v3 = vld [vmem:[#allocation8 + $0xb0] sm:$0xff]  ;;  %v419_v5 = vld [vmem:[#allocation8 + $0xc8] sm:$0xff]  ;;  %v421_v6 = vld [vmem:[#allocation8 + $0xd8] sm:$0xff]  ;;  %v2958_v7 = vpack.c.bf16 %v558_v0, %v556_v63 }
  0xbc   : > { %1913 = vmatpush1.bf16.msra.mxu0 %v1912_v50  ;;  %v555_v9 = vld [vmem:[#allocation10 + $0xa0] sm:$0xff]  ;;  %v557_v11 = vld [vmem:[#allocation10 + $0xb0] sm:$0xff]  ;;  %v1920_v12 = vpack.c.bf16 %v416_v3, %v414_v2  ;;  %v560_v13 = vld [vmem:[#allocation10 + $0xc8] sm:$0xff]  ;;  %v1922_v15 = vpack.c.bf16 %v421_v6, %v419_v5 }
  0xbd   : > { %1915 = vmatprep.subr.bf16.mxu0 %v1914_v53  ;;  %v562_v14 = vld [vmem:[#allocation10 + $0xd8] sm:$0xff]  ;;  %v418_v16 = vld [vmem:[#allocation8 + $0xc0] sm:$0xff]  ;;  %v420_v17 = vld [vmem:[#allocation8 + $0xd0] sm:$0xff]  ;;  %v2961_v19 = vpack.c.bf16 %v557_v11, %v555_v9 }
  0xbe   : > { %1945 = vmatpush1.bf16.msra.mxu1 %v2949_v56  ;;  %v423_v20 = vld [vmem:[#allocation8 + $0xe8] sm:$0xff]  ;;  %v425_v21 = vld [vmem:[#allocation8 + $0xf8] sm:$0xff]  ;;  %v2964_v22 = vpack.c.bf16 %v562_v14, %v560_v13  ;;  %v559_v24 = vld [vmem:[#allocation10 + $0xc0] sm:$0xff]  ;;  %v1924_v26 = vpack.c.bf16 %v420_v17, %v418_v16 }
  0xbf   : > { %1947 = vmatprep.subr.bf16.mxu1 %v2952_v59  ;;  %v561_v25 = vld [vmem:[#allocation10 + $0xd0] sm:$0xff]  ;;  %v564_v27 = vld [vmem:[#allocation10 + $0xe8] sm:$0xff]  ;;  %v566_v29 = vld [vmem:[#allocation10 + $0xf8] sm:$0xff]  ;;  %v1926_v30 = vpack.c.bf16 %v425_v21, %v423_v20 }
  0xc0   : > { %1917 = vmatpush1.bf16.msra.mxu0 %v1916_v62  ;;  %v422_v31 = vld [vmem:[#allocation8 + $0xe0] sm:$0xff]  ;;  %v424_v32 = vld [vmem:[#allocation8 + $0xf0] sm:$0xff]  ;;  %v2967_v33 = vpack.c.bf16 %v561_v25, %v559_v24  ;;  %v2970_v34 = vpack.c.bf16 %v566_v29, %v564_v27  ;;  %v568_v40 = vld [vmem:[#allocation11 + $0x8] sm:$0xff] }
  0xc1   : > { %1919 = vmatprep.subr.bf16.mxu0 %v1918_v1  ;;  %v563_v35 = vld [vmem:[#allocation10 + $0xe0] sm:$0xff]  ;;  %v565_v37 = vld [vmem:[#allocation10 + $0xf0] sm:$0xff]  ;;  %v1928_v38 = vpack.c.bf16 %v424_v32, %v422_v31  ;;  %v570_v48 = vld [vmem:[#allocation11 + $0x18] sm:$0xff] }
  0xc2   : > { %1949 = vmatpush1.bf16.msra.mxu1 %v2955_v4  ;;  %v567_v39 = vld [vmem:[#allocation11] sm:$0xff]  ;;  %v2973_v41 = vpack.c.bf16 %v565_v37, %v563_v35  ;;  %v569_v46 = vld [vmem:[#allocation11 + $0x10] sm:$0xff]  ;;  %v391_v51 = vld [vmem:[%s2909_s15 + $0x8] sm:$0xff] }
  0xc3   : > { %1951 = vmatprep.subr.bf16.mxu1 %v2958_v7  ;;  %v390_v42 = vld [vmem:[%s2909_s15] sm:$0xff]  ;;  %v2977_v43 = vpack.c.bf16 %v568_v40, %v567_v39  ;;  %v634_v49 = vld [vmem:[#allocation3] sm:$0xff]  ;;  %v2982_v50 = vpack.c.bf16 %v570_v48, %v569_v46  ;;  %v572_v53 = vld [vmem:[#allocation11 + $0x28] sm:$0xff] }
  0xc4   : > { %1921 = vmatpush1.bf16.msra.mxu0 %v1920_v12  ;;  %v571_v52 = vld [vmem:[#allocation11 + $0x20] sm:$0xff]  ;;  %v392_v55 = vld [vmem:[%s2909_s15 + $0x10] sm:$0xff]  ;;  %v574_v58 = vld [vmem:[#allocation11 + $0x38] sm:$0xff] }
  0xc5   : > { %1923 = vmatprep.subr.bf16.mxu0 %v1922_v15  ;;  %v2989_v54 = vpack.c.bf16 %v572_v53, %v571_v52  ;;  %v573_v57 = vld [vmem:[#allocation11 + $0x30] sm:$0xff]  ;;  %v393_v61 = vld [vmem:[%s2909_s15 + $0x18] sm:$0xff]  ;;  %v575_v62 = vld [vmem:[#allocation11 + $0x40] sm:$0xff]  ;;  %s2537_s15 = scalar_lea.vmem %s3292_s14, 512 }
  0xc6   : > { %1953 = vmatpush1.bf16.msra.mxu1 %v2961_v19  ;;  %v2995_v60 = vpack.c.bf16 %v574_v58, %v573_v57  ;;  %v576_v63 = vld [vmem:[#allocation11 + $0x48] sm:$0xff]  ;;  %v577_v1 = vld [vmem:[#allocation11 + $0x50] sm:$0xff]  ;;  %v578_v2 = vld [vmem:[#allocation11 + $0x58] sm:$0xff]  ;;  %p2538_p5 = scmp.ne.s32.totalorder %s3292_s14, %s2537_s15  ;;  %p2545_p2 = scmp.lt.s32.totalorder %s2543_s12, %s2537_s15 }
  0xc7   : > { %1955 = vmatprep.subr.bf16.mxu1 %v2964_v22  ;;  %v3001_v0 = vpack.c.bf16 %v576_v63, %v575_v62  ;;  %v3007_v3 = vpack.c.bf16 %v578_v2, %v577_v1  ;;  %v579_v5 = vld [vmem:[#allocation11 + $0x60] sm:$0xff]  ;;  %v580_v6 = vld [vmem:[#allocation11 + $0x68] sm:$0xff]  ;;  %v581_v11 = vld [vmem:[#allocation11 + $0x70] sm:$0xff] }
  0xc8   : > { %1925 = vmatpush1.bf16.msra.mxu0 %v1924_v26  ;;  %v3011_v9 = vpack.c.bf16 %v580_v6, %v579_v5  ;;  %v582_v12 = vld [vmem:[#allocation11 + $0x78] sm:$0xff]  ;;  %v584_v15 = vld [vmem:[#allocation13 + $0x8] sm:$0xff]  ;;  %v583_v17 = vld [vmem:[#allocation13] sm:$0xff]  ;;  %p2539_p7 = pnand %p2538_p5, %p2853_p11  ;;  %p2546_p0 = por %p2545_p2, %p2544_p1 }
  0xc9   : > { %1927 = vmatprep.subr.bf16.mxu0 %v1926_v30  ;;  %v3015_v13 = vpack.c.bf16 %v582_v12, %v581_v11  ;;  %v635_v14 = vld [vmem:[#allocation4] sm:$0xff]  ;;  %v585_v21 = vld [vmem:[#allocation13 + $0x10] sm:$0xff]  ;;  %v588_v24 = vld [vmem:[#allocation13 + $0x28] sm:$0xff] }
  0xca   : > { %1957 = vmatpush1.bf16.msra.mxu1 %v2967_v33  ;;  %v586_v16 = vld [vmem:[#allocation13 + $0x18] sm:$0xff]  ;;  %v3038_v26 = vpack.c.bf16 %v585_v21, %v583_v17  ;;  %v587_v29 = vld [vmem:[#allocation13 + $0x20] sm:$0xff]  ;;  %v589_v30 = vld [vmem:[#allocation13 + $0x30] sm:$0xff]  ;;  %p2540_p13 = pneg %p2539_p7 }
  0xcb   : > { %1959 = vmatprep.subr.bf16.mxu1 %v2970_v34  ;;  %v3036_v20 = vpack.c.bf16 %v586_v16, %v584_v15  ;;  %v590_v25 = vld [vmem:[#allocation13 + $0x38] sm:$0xff]  ;;  %v592_v31 = vld [vmem:[#allocation13 + $0x48] sm:$0xff]  ;;  %v3045_v35 = vpack.c.bf16 %v589_v30, %v587_v29  ;;  %v593_v39 = vld [vmem:[#allocation13 + $0x50] sm:$0xff] }
  0xcc   : > { %1929 = vmatpush1.bf16.msra.mxu0 %v1928_v38  ;;  %v3040_v27 = vpack.c.bf16 %v590_v25, %v588_v24  ;;  %v594_v32 = vld [vmem:[#allocation13 + $0x58] sm:$0xff]  ;;  %v591_v38 = vld [vmem:[#allocation13 + $0x40] sm:$0xff]  ;;  %v596_v40 = vld [vmem:[#allocation13 + $0x68] sm:$0xff]  ;;  %p2547_p10 = pnand %p2546_p0, %p2540_p13 }
  0xcd   : > { %1962 = vmatprep.subr.bf16.mxu0 %v3356_v45  ;;  %v3048_v37 = vpack.c.bf16 %v594_v32, %v592_v31  ;;  %v3051_v46 = vpack.c.bf16 %v593_v39, %v591_v38  ;;  %v600_v52 = vld [vmem:[#allocation13 + $0x88] sm:$0xff]  ;;  %v602_v53 = vld [vmem:[#allocation13 + $0x98] sm:$0xff]  ;;  %v599_v58 = vld [vmem:[#allocation13 + $0x80] sm:$0xff]  ;;  %v428_v38 = vlaneseq }
  0xce   : > { %1961 = vmatpush1.bf16.msra.mxu1 %v2973_v41  ;;  %v3060_v57 = vpack.c.bf16 %v602_v53, %v600_v52  ;;  %v604_v63 = vld [vmem:[#allocation13 + $0xa8] sm:$0xff]  ;;  %v606_v1 = vld [vmem:[#allocation13 + $0xb8] sm:$0xff]  ;;  %v603_v5 = vld [vmem:[#allocation13 + $0xa0] sm:$0xff] }
  0xcf   : > { %503 = vmatmul.mubr.f32.vlgmr.msra.gmra.mrb[0].mxu0 %v390_v42  ;;  %1987 = vmatprep.subr.bf16.mxu1 %v3036_v20  ;;  %v598_v42 = vld [vmem:[#allocation13 + $0x78] sm:$0xff]  ;;  %v3067_v2 = vpack.c.bf16 %v606_v1, %v604_v63  ;;  %v605_v6 = vld [vmem:[#allocation13 + $0xb0] sm:$0xff]  ;;  %v608_v12 = vld [vmem:[#allocation13 + $0xc8] sm:$0xff]  ;;  %v3086_v39 = vshrl.u32 %v428_v38, 7 }
  0xd0   : > { %1964 = vmatpush3.bf16.msra.mxu0 %v2977_v43  ;;  %508 = vmatprep.mubr.f32.mxu0 %v2623_v8  ;;  %v3054_v48 = vpack.c.bf16 %v598_v42, %v596_v40  ;;  %v3069_v11 = vpack.c.bf16 %v605_v6, %v603_v5  ;;  %v607_v16 = vld [vmem:[#allocation13 + $0xc0] sm:$0xff]  ;;  %v609_v17 = vld [vmem:[#allocation13 + $0xd0] sm:$0xff]  ;;  %v612_v21 = vld [vmem:[#allocation13 + $0xe8] sm:$0xff] }
  0xd1   : > { %703 = vmatmul.mubr.f32.vlgmr.msra.gmra.mrb[0].mxu1 %v634_v49  ;;  %1965 = vmatprep.subr.bf16.mxu0 %v3356_v45  ;;  %v595_v49 = vld [vmem:[#allocation13 + $0x60] sm:$0xff]  ;;  %v3075_v24 = vpack.c.bf16 %v609_v17, %v607_v16  ;;  %v614_v25 = vld [vmem:[#allocation13 + $0xf8] sm:$0xff]  ;;  %v613_v30 = vld [vmem:[#allocation13 + $0xf0] sm:$0xff]  ;;  %v3355_v40 = vsub.s32 0, %v3086_v39  ;;  %v434_v52 = vsub.s32 1, %v3086_v39 }
  0xd2   : > { %846 = vmatprep.mubr.f32.mxu1 %v2623_v8  ;;  %1989 = vmatpush1.bf16.msra.mxu1 %v3038_v26  ;;  %v611_v29 = vld [vmem:[#allocation13 + $0xe0] sm:$0xff]  ;;  %v3078_v31 = vpack.c.bf16 %v614_v25, %v612_v21  ;;  %v426_v42 = vld [vmem:[%s3339_s2] sm:$0x3] }
  0xd3   : > { %509 = vmatmul.mubr.f32.gmra.mrb[2].mxu0 %v391_v51  ;;  %1991 = vmatprep.subr.bf16.mxu1 %v3040_v27  ;;  %v597_v51 = vld [vmem:[#allocation13 + $0x70] sm:$0xff]  ;;  %v3081_v32 = vpack.c.bf16 %v613_v30, %v611_v29  ;;  %v435_v5 = vrot.slane %v426_v42, %v434_v52 }
  0xd4   : > { %1967 = vmatpush3.bf16.msra.mxu0 %v2982_v50  ;;  %514 = vmatprep.mubr.f32.mxu0 %v2623_v8 }
  0xd5   : > { %1968 = vmatprep.subr.bf16.mxu0 %v3356_v45 }
  0xd6   : > { %1993 = vmatpush1.bf16.msra.mxu1 %v3045_v35 }
  0xd7   : > { %515 = vmatmul.mubr.f32.gmra.mrb[4].mxu0 %v392_v55  ;;  %1995 = vmatprep.subr.bf16.mxu1 %v3048_v37  ;;  %v3057_v55 = vpack.c.bf16 %v597_v51, %v595_v49  ;;  %v431_v49 = vrot.slane %v426_v42, %v3355_v40 }
  0xd8   : > { %1970 = vmatpush3.bf16.msra.mxu0 %v2989_v54  ;;  %520 = vmatprep.mubr.f32.mxu0 %v2623_v8 }
  0xd9   : > { %1971 = vmatprep.subr.bf16.mxu0 %v3356_v45 }
  0xda   : > { %1997 = vmatpush1.bf16.msra.mxu1 %v3051_v46 }
  0xdb   : > { %521 = vmatmul.mubr.f32.gmra.mrb[6].mxu0 %v393_v61  ;;  %1999 = vmatprep.subr.bf16.mxu1 %v3054_v48  ;;  %v601_v61 = vld [vmem:[#allocation13 + $0x90] sm:$0xff] }
  0xdc   : > { %1973 = vmatpush3.bf16.msra.mxu0 %v2995_v60  ;;  %1790 = vmatprep.mubr.msk.f32.mxu0 %vm2625_vm0, %v2623_v8  ;;  %v3063_v62 = vpack.c.bf16 %v601_v61, %v599_v58 }
  0xdd   : > { %1974 = vmatprep.subr.bf16.mxu0 %v3356_v45 }
  0xde   : > { %2001 = vmatpush1.bf16.msra.mxu1 %v3057_v55 }
  0xdf   : > { %2003 = vmatprep.subr.bf16.mxu1 %v3060_v57 }
  0xe0   : > { %1976 = vmatpush3.bf16.msra.mxu0 %v3001_v0 }
  0xe1   : > { %1977 = vmatprep.subr.bf16.mxu0 %v3356_v45 }
  0xe2   : > { %2005 = vmatpush1.bf16.msra.mxu1 %v3063_v62 }
  0xe3   : > { %2007 = vmatprep.subr.bf16.mxu1 %v3067_v2 }
  0xe4   : > { %1979 = vmatpush3.bf16.msra.mxu0 %v3007_v3 }
  0xe5   : > { %1980 = vmatprep.subr.bf16.mxu0 %v3356_v45 }
  0xe6   : > { %2009 = vmatpush1.bf16.msra.mxu1 %v3069_v11 }
  0xe8   : > { %1982 = vmatpush3.bf16.msra.mxu0 %v3011_v9 }
  0xe9   : > { %1983 = vmatprep.subr.bf16.mxu0 %v3356_v45 }
  0xec   : > { %1985 = vmatpush3.bf16.msra.mxu0 %v3015_v13 }
  0xed   : > { %2019 = vmatprep.subr.bf16.mxu0 %v2929_v10 }
  0xef   : > { %1791 = vmatmul.mubr.f32.vlgmr.msra.gmra.mrb[8].mxu0 %v635_v14  ;;  %v610_v14 = vld [vmem:[#allocation13 + $0xd8] sm:$0xff] }
  0xf0   : > { %2021 = vmatpush1.bf16.msra.mxu0 %v2932_v18  ;;  %926 = vmatprep.mubr.f32.mxu0 %v2623_v8  ;;  %v3073_v15 = vpack.c.bf16 %v610_v14, %v608_v12 }
  0xf1   : > { %2023 = vmatprep.subr.bf16.mxu0 %v2934_v23 }
  0xf2   : > { %2011 = vmatprep.subr.bf16.mxu1 %v3073_v15 }
  0xf3   : > { %2013 = vmatpush1.bf16.msra.mxu1 %v3075_v24 }
  0xf4   : > { %2025 = vmatpush1.bf16.msra.mxu0 %v2937_v28  ;;  %2015 = vmatprep.subr.bf16.mxu1 %v3078_v31 }
  0xf5   : > { %2027 = vmatprep.subr.bf16.mxu0 %v2940_v36 }
  0xf7   : > { %2017 = vmatpush1.bf16.msra.mxu1 %v3081_v32 }
  0xf8   : > { %2029 = vmatpush1.bf16.msra.mxu0 %v2943_v44  ;;  %2050 = vmatprep.subr.bf16.mxu1 %v3356_v45 }
  0xf9   : > { %2031 = vmatprep.subr.bf16.mxu0 %v2946_v47 }
  0xfc   : > { %2033 = vmatpush1.bf16.msra.mxu0 %v2949_v56 }
  0xfd   : > { %2035 = vmatprep.subr.bf16.mxu0 %v2952_v59 }
 0x100   : > { %2037 = vmatpush1.bf16.msra.mxu0 %v2955_v4 }
 0x101   : > { %2039 = vmatprep.subr.bf16.mxu0 %v2958_v7 }
 0x104   : > { %2041 = vmatpush1.bf16.msra.mxu0 %v2961_v19 }
 0x105   : > { %2043 = vmatprep.subr.bf16.mxu0 %v2964_v22 }
 0x108   : > { %2045 = vmatpush1.bf16.msra.mxu0 %v2967_v33 }
 0x109   : > { %2047 = vmatprep.subr.bf16.mxu0 %v2970_v34 }
 0x10c   : > { %2049 = vmatpush1.bf16.msra.mxu0 %v2973_v41 }
 0x10d   : > { %2075 = vmatprep.subr.bf16.mxu0 %v3036_v20 }
 0x1a2   : > { %v504_v51 = vpop.f32.mrb[0].mxu0 }
 0x1a3   : > { %v505_v53 = vadd.f32 %v504_v51, %v431_v49  ;;  %v3095_v58 = vpop.f32.mrb[1].mxu0 }
 0x1a4   : > { %v704_v61 = vpop.f32.mrb[0].mxu1 }
 0x1a5   : > { %v779_v63 = vadd.f32 %v704_v61, %v505_v53  ;;  %v3097_v1 = vpop.f32.mrb[1].mxu1 }
 0x1a6   : > { %v510_v6 = vpop.f32.mrb[2].mxu0 }
 0x1a7   : > { %v3099_v12 = vadd.f32 %v510_v6, %v431_v49  ;;  %v512_v14 = vpop.f32.mrb[3].mxu0 }
 0x1a8   : > { %v3101_v16 = vadd.f32 %v512_v14, %v435_v5 }
 0x1aa   : > { %v516_v17 = vpop.f32.mrb[4].mxu0 }
 0x1ab   : > { %v3103_v21 = vadd.f32 %v516_v17, %v431_v49  ;;  %v518_v25 = vpop.f32.mrb[5].mxu0 }
 0x1ac   : > { %v3105_v29 = vadd.f32 %v518_v25, %v435_v5 }
 0x1ae   : > { %v522_v30 = vpop.f32.mrb[6].mxu0 }
 0x1af   : > { %v3107_v38 = vadd.f32 %v522_v30, %v431_v49  ;;  %v524_v51 = vpop.f32.mrb[7].mxu0  ;;  %v3379_v49 = vsub.s32 0, %v3086_v39 }
 0x1b0   : > { %v3109_v53 = vadd.f32 %v524_v51, %v435_v5  ;;  %v507_v51 = vadd.f32 %v3095_v58, %v435_v5  ;;  %v3380_v5 = vmov 0.0|0.0  }
 0x1c2   : > { %v775_v61 = vpop.f32.mrb[8].mxu0 }
 0x1c3   : > { %v780_v42 = vadd.f32 %v779_v63, %v775_v61  ;;  %v1792_v40 = vpop.f32.mrb[9].mxu0 }
 0x1c4   : > { %v615_v40 = vld [vmem:[%s3343_s6] sm:$0x3] }
 0x1c5   : > { %2379 = vtanh.f32 %v780_v42  ;;  %v3151_v63 = vrot.slane %v615_v40, %v3379_v49  ;;  %v3153_v14 = vrot.slane %v615_v40, %v434_v52 }
 0x1cf   : > { %v2380_v6 = vpop.eup %2379 }
 0x1d0   : > { %847 = vmatmul.mubr.f32.vlgmr.msra.gmra.mrb[2].mxu1 %v2380_v6 }
 0x1d1   : > { %2052 = vmatpush3.bf16.msra.mxu1 %v2977_v43  ;;  %1825 = vmatprep.mubr.msk.f32.mxu1 %vm2625_vm0, %v2623_v8 }
 0x1d2   : > { %2053 = vmatprep.subr.bf16.mxu1 %v3356_v45 }
 0x1d5   : > { %2055 = vmatpush3.bf16.msra.mxu1 %v2982_v50 }
 0x1d6   : > { %2056 = vmatprep.subr.bf16.mxu1 %v3356_v45 }
 0x1d9   : > { %2058 = vmatpush3.bf16.msra.mxu1 %v2989_v54 }
 0x1da   : > { %2059 = vmatprep.subr.bf16.mxu1 %v3356_v45 }
 0x1dd   : > { %2061 = vmatpush3.bf16.msra.mxu1 %v2995_v60 }
 0x1de   : > { %2062 = vmatprep.subr.bf16.mxu1 %v3356_v45 }
 0x1e1   : > { %2064 = vmatpush3.bf16.msra.mxu1 %v3001_v0 }
 0x1e2   : > { %2065 = vmatprep.subr.bf16.mxu1 %v3356_v45 }
 0x1e5   : > { %2067 = vmatpush3.bf16.msra.mxu1 %v3007_v3 }
 0x1e6   : > { %2068 = vmatprep.subr.bf16.mxu1 %v3356_v45 }
 0x1e9   : > { %2070 = vmatpush3.bf16.msra.mxu1 %v3011_v9 }
 0x1ea   : > { %2071 = vmatprep.subr.bf16.mxu1 %v3356_v45  ;;  %v3162_v45 = vld [vmem:[%s3344_s7] ss:$0 sm:$0xff] }
 0x1ed   : > { %2073 = vmatpush3.bf16.msra.mxu1 %v3015_v13 }
 0x1ee   : > { %2107 = vmatprep.subr.bf16.mxu1 %v2929_v10 }
 0x1f0   : > { %1826 = vmatmul.mubr.f32.vlgmr.msra.gmra.mrb[4].mxu1 %v2380_v6 }
 0x1f1   : > { %2109 = vmatpush1.bf16.msra.mxu1 %v2932_v18  ;;  %1151 = vmatprep.mubr.f32.mxu1 %v2623_v8 }
 0x1f2   : > { %2111 = vmatprep.subr.bf16.mxu1 %v2934_v23 }
 0x1f5   : > { %2113 = vmatpush1.bf16.msra.mxu1 %v2937_v28 }
 0x1f6   : > { %2115 = vmatprep.subr.bf16.mxu1 %v2940_v36 }
 0x1f9   : > { %2117 = vmatpush1.bf16.msra.mxu1 %v2943_v44 }
 0x1fa   : > { %2119 = vmatprep.subr.bf16.mxu1 %v2946_v47 }
 0x1fd   : > { %2121 = vmatpush1.bf16.msra.mxu1 %v2949_v56 }
 0x1fe   : > { %2123 = vmatprep.subr.bf16.mxu1 %v2952_v59 }
 0x201   : > { %2125 = vmatpush1.bf16.msra.mxu1 %v2955_v4 }
 0x202   : > { %2127 = vmatprep.subr.bf16.mxu1 %v2958_v7 }
 0x205   : > { %2129 = vmatpush1.bf16.msra.mxu1 %v2961_v19 }
 0x206   : > { %2131 = vmatprep.subr.bf16.mxu1 %v2964_v22 }
 0x209   : > { %2133 = vmatpush1.bf16.msra.mxu1 %v2967_v33 }
 0x20a   : > { %2135 = vmatprep.subr.bf16.mxu1 %v2970_v34 }
 0x20d   : > { %2137 = vmatpush1.bf16.msra.mxu1 %v2973_v41 }
 0x20e   : > { %2163 = vmatprep.subr.bf16.mxu1 %v3036_v20 }
 0x2a3   : > { %v848_v17 = vpop.f32.mrb[2].mxu1 }
 0x2a4   : > { %v849_v25 = vadd.f32 %v848_v17, %v3151_v63  ;;  %v850_v30 = vpop.f32.mrb[3].mxu1 }
 0x2a5   : > { %v851_v61 = vadd.f32 %v850_v30, %v3153_v14 }
 0x2a6   : > { %v853_v42 = vmul.f32 %v849_v25, %v3097_v1 }
 0x2a7   : > { %v854_v6 = vmul.f32 %v851_v61, %v507_v51 }
 0x2a9   : > { %v855_v39 = vadd.f32 %v854_v6, %v853_v42 }
 0x2ab   : > { %v856_v52 = vadd.f32 %v3162_v45, %v855_v39 }
 0x2ad   : > { %2381 = vtanh.f32 %v856_v52 }
 0x2b7   : > { %v2382_v40 = vpop.eup %2381 }
 0x2b8   : > { %858 = vst [vmem:[%s2923_s13] sm:$0xff] %v2382_v40  ;;  %927 = vmatmul.mubr.f32.vlgmr.msra.gmra.mrb[10].mxu0 %v2382_v40 }
 0x2b9   : > { %2077 = vmatpush1.bf16.msra.mxu0 %v3038_v26  ;;  %1070 = vmatprep.mubr.f32.mxu0 %v2623_v8 }
 0x2ba   : > { %2079 = vmatprep.subr.bf16.mxu0 %v3040_v27 }
 0x2bd   : > { %2081 = vmatpush1.bf16.msra.mxu0 %v3045_v35 }
 0x2be   : > { %2083 = vmatprep.subr.bf16.mxu0 %v3048_v37 }
 0x2c1   : > { %2085 = vmatpush1.bf16.msra.mxu0 %v3051_v46 }
 0x2c2   : > { %2087 = vmatprep.subr.bf16.mxu0 %v3054_v48 }
 0x2c3   : > { %v999_v58 = vpop.f32.mrb[4].mxu1 }
 0x2c4   : > { %v1827_v1 = vpop.f32.mrb[5].mxu1 }
 0x2c5   : > { %2089 = vmatpush1.bf16.msra.mxu0 %v3057_v55 }
 0x2c6   : > { %2091 = vmatprep.subr.bf16.mxu0 %v3060_v57 }
 0x2c9   : > { %2093 = vmatpush1.bf16.msra.mxu0 %v3063_v62 }
 0x2ca   : > { %2095 = vmatprep.subr.bf16.mxu0 %v3067_v2 }
 0x2cd   : > { %2097 = vmatpush1.bf16.msra.mxu0 %v3069_v11 }
 0x2ce   : > { %2099 = vmatprep.subr.bf16.mxu0 %v3073_v15 }
 0x2d1   : > { %2101 = vmatpush1.bf16.msra.mxu0 %v3075_v24 }
 0x2d2   : > { %2103 = vmatprep.subr.bf16.mxu0 %v3078_v31 }
 0x2d5   : > { %2105 = vmatpush1.bf16.msra.mxu0 %v3081_v32 }
 0x2d6   : > { %2138 = vmatprep.subr.bf16.mxu0 %v3380_v5 }
 0x38b   : > { %v928_v49 = vpop.f32.mrb[10].mxu0 }
 0x38c   : > { %v1003_v17 = vadd.f32 %v928_v49, %v3099_v12  ;;  %v930_v25 = vpop.f32.mrb[11].mxu0 }
 0x38e   : > { %v1004_v30 = vadd.f32 %v1003_v17, %v999_v58 }
 0x390   : > { %2383 = vtanh.f32 %v1004_v30 }
 0x39a   : > { %v2384_v51 = vpop.eup %2383 }
 0x39b   : > { %1071 = vmatmul.mubr.f32.vlgmr.msra.gmra.mrb[12].mxu0 %v2384_v51 }
 0x39c   : > { %2140 = vmatpush3.bf16.msra.mxu0 %v2977_v43  ;;  %1860 = vmatprep.mubr.msk.f32.mxu0 %vm2625_vm0, %v2623_v8 }
 0x39d   : > { %2141 = vmatprep.subr.bf16.mxu0 %v3380_v5 }
 0x3a0   : > { %2143 = vmatpush3.bf16.msra.mxu0 %v2982_v50 }
 0x3a1   : > { %2144 = vmatprep.subr.bf16.mxu0 %v3380_v5 }
 0x3a4   : > { %2146 = vmatpush3.bf16.msra.mxu0 %v2989_v54 }
 0x3a5   : > { %2147 = vmatprep.subr.bf16.mxu0 %v3380_v5 }
 0x3a8   : > { %2149 = vmatpush3.bf16.msra.mxu0 %v2995_v60 }
 0x3a9   : > { %2150 = vmatprep.subr.bf16.mxu0 %v3380_v5 }
 0x3ac   : > { %2152 = vmatpush3.bf16.msra.mxu0 %v3001_v0 }
 0x3ad   : > { %2153 = vmatprep.subr.bf16.mxu0 %v3380_v5 }
 0x3b0   : > { %2155 = vmatpush3.bf16.msra.mxu0 %v3007_v3 }
 0x3b1   : > { %2156 = vmatprep.subr.bf16.mxu0 %v3380_v5 }
 0x3b4   : > { %2158 = vmatpush3.bf16.msra.mxu0 %v3011_v9 }
 0x3b5   : > { %2159 = vmatprep.subr.bf16.mxu0 %v3380_v5 }
 0x3b8   : > { %2161 = vmatpush3.bf16.msra.mxu0 %v3015_v13 }
 0x3b9   : > { %2195 = vmatprep.subr.bf16.mxu0 %v2929_v10 }
 0x3bb   : > { %1861 = vmatmul.mubr.f32.vlgmr.msra.gmra.mrb[14].mxu0 %v2384_v51 }
 0x3bc   : > { %2197 = vmatpush1.bf16.msra.mxu0 %v2932_v18  ;;  %1376 = vmatprep.mubr.f32.mxu0 %v2623_v8 }
 0x3bd   : > { %2199 = vmatprep.subr.bf16.mxu0 %v2934_v23 }
 0x3c0   : > { %2201 = vmatpush1.bf16.msra.mxu0 %v2937_v28 }
 0x3c1   : > { %2203 = vmatprep.subr.bf16.mxu0 %v2940_v36 }
 0x3c4   : > { %2205 = vmatpush1.bf16.msra.mxu0 %v2943_v44 }
 0x3c5   : > { %2207 = vmatprep.subr.bf16.mxu0 %v2946_v47 }
 0x3c8   : > { %2209 = vmatpush1.bf16.msra.mxu0 %v2949_v56 }
 0x3c9   : > { %2211 = vmatprep.subr.bf16.mxu0 %v2952_v59 }
 0x3cc   : > { %2213 = vmatpush1.bf16.msra.mxu0 %v2955_v4 }
 0x3cd   : > { %2215 = vmatprep.subr.bf16.mxu0 %v2958_v7 }
 0x3d0   : > { %2217 = vmatpush1.bf16.msra.mxu0 %v2961_v19 }
 0x3d1   : > { %2219 = vmatprep.subr.bf16.mxu0 %v2964_v22 }
 0x3d4   : > { %2221 = vmatpush1.bf16.msra.mxu0 %v2967_v33 }
 0x3d5   : > { %2223 = vmatprep.subr.bf16.mxu0 %v2970_v34 }
 0x3d8   : > { %2225 = vmatpush1.bf16.msra.mxu0 %v2973_v41 }
 0x3d9   : > { %2251 = vmatprep.subr.bf16.mxu0 %v3036_v20 }
 0x46e   : > { %v1072_v10 = vpop.f32.mrb[12].mxu0 }
 0x46f   : > { %v1073_v18 = vadd.f32 %v1072_v10, %v3151_v63  ;;  %v1074_v23 = vpop.f32.mrb[13].mxu0 }
 0x470   : > { %v1075_v28 = vadd.f32 %v1074_v23, %v3153_v14 }
 0x471   : > { %v1077_v36 = vmul.f32 %v1073_v18, %v930_v25 }
 0x472   : > { %v1078_v44 = vmul.f32 %v1075_v28, %v3101_v16 }
 0x474   : > { %v1079_v47 = vadd.f32 %v1078_v44, %v1077_v36 }
 0x476   : > { %v1080_v56 = vadd.f32 %v3162_v45, %v1079_v47 }
 0x478   : > { %2385 = vtanh.f32 %v1080_v56 }
 0x482   : > { %v2386_v59 = vpop.eup %2385 }
 0x483   : > { %1680 = vst [vmem:[%s2923_s13 + $0x8] sm:$0xff] %v2386_v59  ;;  %1152 = vmatmul.mubr.f32.vlgmr.msra.gmra.mrb[6].mxu1 %v2386_v59 }
 0x484   : > { %2165 = vmatpush1.bf16.msra.mxu1 %v3038_v26  ;;  %1295 = vmatprep.mubr.f32.mxu1 %v2623_v8 }
 0x485   : > { %2167 = vmatprep.subr.bf16.mxu1 %v3040_v27 }
 0x488   : > { %2169 = vmatpush1.bf16.msra.mxu1 %v3045_v35 }
 0x489   : > { %2171 = vmatprep.subr.bf16.mxu1 %v3048_v37 }
 0x48c   : > { %2173 = vmatpush1.bf16.msra.mxu1 %v3051_v46 }
 0x48d   : > { %2175 = vmatprep.subr.bf16.mxu1 %v3054_v48 }
 0x48e   : > { %v1224_v4 = vpop.f32.mrb[14].mxu0 }
 0x48f   : > { %v1862_v7 = vpop.f32.mrb[15].mxu0 }
 0x490   : > { %2177 = vmatpush1.bf16.msra.mxu1 %v3057_v55 }
 0x491   : > { %2179 = vmatprep.subr.bf16.mxu1 %v3060_v57 }
 0x494   : > { %2181 = vmatpush1.bf16.msra.mxu1 %v3063_v62 }
 0x495   : > { %2183 = vmatprep.subr.bf16.mxu1 %v3067_v2 }
 0x498   : > { %2185 = vmatpush1.bf16.msra.mxu1 %v3069_v11 }
 0x499   : > { %2187 = vmatprep.subr.bf16.mxu1 %v3073_v15 }
 0x49c   : > { %2189 = vmatpush1.bf16.msra.mxu1 %v3075_v24 }
 0x49d   : > { %2191 = vmatprep.subr.bf16.mxu1 %v3078_v31 }
 0x4a0   : > { %2193 = vmatpush1.bf16.msra.mxu1 %v3081_v32 }
 0x4a1   : > { %2226 = vmatprep.subr.bf16.mxu1 %v3380_v5 }
 0x556   : > { %v1153_v19 = vpop.f32.mrb[6].mxu1 }
 0x557   : > { %v1228_v22 = vadd.f32 %v1153_v19, %v3103_v21  ;;  %v1155_v33 = vpop.f32.mrb[7].mxu1 }
 0x559   : > { %v1229_v34 = vadd.f32 %v1228_v22, %v1224_v4 }
 0x55b   : > { %2387 = vtanh.f32 %v1229_v34 }
 0x565   : > { %v2388_v41 = vpop.eup %2387 }
 0x566   : > { %1296 = vmatmul.mubr.f32.vlgmr.msra.gmra.mrb[8].mxu1 %v2388_v41 }
 0x567   : > { %2228 = vmatpush3.bf16.msra.mxu1 %v2977_v43  ;;  %1895 = vmatprep.mubr.msk.f32.mxu1 %vm2625_vm0, %v2623_v8 }
 0x568   : > { %2229 = vmatprep.subr.bf16.mxu1 %v3380_v5 }
 0x56b   : > { %2231 = vmatpush3.bf16.msra.mxu1 %v2982_v50 }
 0x56c   : > { %2232 = vmatprep.subr.bf16.mxu1 %v3380_v5 }
 0x56f   : > { %2234 = vmatpush3.bf16.msra.mxu1 %v2989_v54 }
 0x570   : > { %2235 = vmatprep.subr.bf16.mxu1 %v3380_v5 }
 0x573   : > { %2237 = vmatpush3.bf16.msra.mxu1 %v2995_v60 }
 0x574   : > { %2238 = vmatprep.subr.bf16.mxu1 %v3380_v5 }
 0x577   : > { %2240 = vmatpush3.bf16.msra.mxu1 %v3001_v0 }
 0x578   : > { %2241 = vmatprep.subr.bf16.mxu1 %v3380_v5 }
 0x57b   : > { %2243 = vmatpush3.bf16.msra.mxu1 %v3007_v3 }
 0x57c   : > { %2244 = vmatprep.subr.bf16.mxu1 %v3380_v5 }
 0x57f   : > { %2246 = vmatpush3.bf16.msra.mxu1 %v3011_v9 }
 0x580   : > { %2247 = vmatprep.subr.bf16.mxu1 %v3380_v5 }
 0x583   : > { %2249 = vmatpush3.bf16.msra.mxu1 %v3015_v13 }
 0x586   : > { %1896 = vmatmul.mubr.f32.vlgmr.msra.gmra.mrb[10].mxu1 %v2388_v41 }
 0x639   : > { %v1297_v43 = vpop.f32.mrb[8].mxu1 }
 0x63a   : > { %v1298_v50 = vadd.f32 %v1297_v43, %v3151_v63  ;;  %v1299_v54 = vpop.f32.mrb[9].mxu1 }
 0x63b   : > { %v1300_v60 = vadd.f32 %v1299_v54, %v3153_v14 }
 0x63c   : > { %v1302_v0 = vmul.f32 %v1298_v50, %v1155_v33 }
 0x63d   : > { %v1303_v20 = vmul.f32 %v1300_v60, %v3105_v29 }
 0x63f   : > { %v1304_v3 = vadd.f32 %v1303_v20, %v1302_v0 }
 0x641   : > { %v1305_v12 = vadd.f32 %v3162_v45, %v1304_v3 }
 0x643   : > { %2389 = vtanh.f32 %v1305_v12 }
 0x64d   : > { %v2390_v16 = vpop.eup %2389 }
 0x64e   : > { %1681 = vst [vmem:[%s2923_s13 + $0x10] sm:$0xff] %v2390_v16  ;;  %1377 = vmatmul.mubr.f32.vlgmr.msra.gmra.mrb[16].mxu0 %v2390_v16 }
 0x64f   : > { %2253 = vmatpush1.bf16.msra.mxu0 %v3038_v26  ;;  %1520 = vmatprep.mubr.f32.mxu0 %v2623_v8 }
 0x650   : > { %2255 = vmatprep.subr.bf16.mxu0 %v3040_v27 }
 0x653   : > { %2257 = vmatpush1.bf16.msra.mxu0 %v3045_v35 }
 0x654   : > { %2259 = vmatprep.subr.bf16.mxu0 %v3048_v37 }
 0x657   : > { %2261 = vmatpush1.bf16.msra.mxu0 %v3051_v46 }
 0x658   : > { %2263 = vmatprep.subr.bf16.mxu0 %v3054_v48 }
 0x659   : > { %v1449_v9 = vpop.f32.mrb[10].mxu1 }
 0x65a   : > { %v1897_v13 = vpop.f32.mrb[11].mxu1 }
 0x65b   : > { %2265 = vmatpush1.bf16.msra.mxu0 %v3057_v55 }
 0x65c   : > { %2267 = vmatprep.subr.bf16.mxu0 %v3060_v57 }
 0x65f   : > { %2269 = vmatpush1.bf16.msra.mxu0 %v3063_v62 }
 0x660   : > { %2271 = vmatprep.subr.bf16.mxu0 %v3067_v2 }
 0x663   : > { %2273 = vmatpush1.bf16.msra.mxu0 %v3069_v11 }
 0x664   : > { %2275 = vmatprep.subr.bf16.mxu0 %v3073_v15 }
 0x667   : > { %2277 = vmatpush1.bf16.msra.mxu0 %v3075_v24 }
 0x668   : > { %2279 = vmatprep.subr.bf16.mxu0 %v3078_v31 }
 0x66b   : > { %2281 = vmatpush1.bf16.msra.mxu0 %v3081_v32 }
 0x721   : > { %v1378_v8 = vpop.f32.mrb[16].mxu0 }
 0x722   : > { %v1453_v26 = vadd.f32 %v1378_v8, %v3107_v38  ;;  %v1380_v27 = vpop.f32.mrb[17].mxu0 }
 0x724   : > { %v1454_v35 = vadd.f32 %v1453_v26, %v1449_v9 }
 0x726   : > { %2391 = vtanh.f32 %v1454_v35 }
 0x730   : > { %v2392_v37 = vpop.eup %2391 }
 0x731   : > { %1535 = vst [vmem:[#allocation4] sm:$0xff] %v2392_v37  ;;  %1521 = vmatmul.mubr.f32.vlgmr.msra.gmra.mrb[18].mxu0 %v2392_v37 }
 0x804   : > { %v1522_v46 = vpop.f32.mrb[18].mxu0 }
 0x805   : > { %v1523_v48 = vadd.f32 %v1522_v46, %v3151_v63  ;;  %v1524_v55 = vpop.f32.mrb[19].mxu0 }
 0x806   : > { %v1525_v57 = vadd.f32 %v1524_v55, %v3153_v14 }
 0x807   : > { %v1527_v62 = vmul.f32 %v1523_v48, %v1380_v27 }
 0x808   : > { %v1528_v2 = vmul.f32 %v1525_v57, %v3109_v53 }
 0x80a   : > { %v1529_v11 = vadd.f32 %v1528_v2, %v1527_v62 }
 0x80c   : > { %v1530_v15 = vadd.f32 %v3162_v45, %v1529_v11 }
 0x80e   : > { %2393 = vtanh.f32 %v1530_v15 }
 0x818   : > { %v2394_v24 = vpop.eup %2393 }
 0x819   : > { %1682 = vst [vmem:[%s2923_s13 + $0x18] sm:$0xff] %v2394_v24  ;;  %1534 = vst [vmem:[#allocation3] sm:$0xff] %v2394_v24 }
 0x81a   : > { %2550 = shalt.err (!%p2547_p10)
}
 0x81b   : > { %s2551_s13 = scalar_lea.hbm %s3290_s1, 512  ;;  %s2555_s19 = scalar_lea.hbm %s3345_s8, 1024 }
 0x81c   : > { %p2552_p3 = scmp.ne.s32.totalorder %s3290_s1, %s2551_s13  ;;  %p2556_p4 = scmp.lt.u32.totalorder %s3290_s1, %s3345_s8 }
 0x81d   : > { %p2557_p9 = scmp.lt.u32.totalorder %s2555_s19, %s2551_s13  ;;  %p2559_p5 = scmp.lt.u32.totalorder %s2551_s13, %s3290_s1 }
 0x81e   : > { %p2553_p12 = pnand %p2552_p3, %p2853_p11 }
 0x81f   : > { %p2558_p8 = por %p2557_p9, %p2556_p4 }
 0x820   : > { %p2554_p6 = pneg %p2553_p12 }
 0x821   : > { %p2560_p7 = por %p2559_p5, %p2558_p8 }
 0x823   : > { %p2561_p13 = pnand %p2560_p7, %p2554_p6 }
 0x825   : > { %2564 = shalt.err (!%p2561_p13)
}
 0x826   : > { %s2627_s20 = smov 128   ;;  %s2628_s24 = smov 8  }
 0x827   : > { %2300 = dma.vmem_to_hbm [thread:$0]  (%p2853_p11), %s3292_s14, 512, %s3290_s1, %s1537_s17, %s2627_s20, %s2627_s20, %s2628_s24  }
 0x828 PF: > { %s3381_s15 = sld [smem:[#allocation19_spill]]  ;;  %s1565_s9 = sand.u32 1, %s2599_s27  }
 0x829   : > { %p3383_p2 = scmp.ge.s32.totalorder %s2611_s30, 2  ;;  %s1566_s11 = scalar_lea.sflag [#allocation7], %s1565_s9 }
 0x82e   : > { %p3382_p1 = scmp.ne.s32.totalorder %s3381_s15, 0 }
 0x830   : > { %p2320_p0 = pnand %p3383_p2, %p3382_p1 }
 0x832   : > { %2594 = dma.done.wait (!%p2320_p0), %s1566_s11, 512  }
 0x833   : > { %2596 = vsyncadd (!%p2320_p0), %s1566_s11, 4294966784  ;;  %p23_p10 = scmp.ge.s32.totalorder %s2840_s16, 4   ;;  %s3384_s27 = smov %s2603_s28 }
 0x834   : > { %s3385_s28 = smov %s2607_s29  ;;  %s3386_s29 = smov %s2849_s25 }
 0x835   : > { %s3387_s30 = smov %s2840_s16  ;;  %25 = sbr.rel (!%p23_p10) target bundleno = 9 (0x9), region = 123 }
 0x83c   :  { %1571 = vsyncpa [#allocation6], 1 }
 0x83d   :  { %1573 = vsyncpa [#allocation6 + $0x1], 1 }
 0x83e   :  { %1574 = vsyncpa [#allocation9], 1 }
 0x83f   :  { %1575 = vsyncpa [#allocation12], 1 }
 0x840   :  { %1576 = vsyncpa [#allocation7], 1 }
 0x841   :  { %1578 = vsyncpa [#allocation7 + $0x1], 1 }

</bundles_post_ra>
